<compile_context>
chip_gen: v6e
topology: v6e:2x2x1
jax: 0.10.0
libtpu: 0.0.40
codegen_flags: <defaults>
</compile_context>

<pallas_src>
import math
from functools import partial

import jax
import jax.numpy as jnp
from jax.experimental import pallas as pl
from jax.experimental.pallas import tpu as pltpu


# ----------------------------------------------------------------------------
# Pallas kernels
# ----------------------------------------------------------------------------
def _softmax_last(s):
    s = s - jnp.max(s, axis=-1, keepdims=True)
    e = jnp.exp(s)
    return e / jnp.sum(e, axis=-1, keepdims=True)


def _nystrom_attn_kernel(qkv_ref, o_ref, *, heads, dim_head, m, l, iters):
    """qkv_ref: (N, 3*heads*dim_head) fused qkv for one batch element (scale already
    folded into the q columns).  o_ref: (N, heads*dim_head), written in 'n (h d)'."""
    D = dim_head
    inner = heads * dim_head
    inv_l = 1.0 / float(l)

    # m x m identity, built once per grid step (shared by all heads).
    ri = jax.lax.broadcasted_iota(jnp.int32, (m, m), 0)
    ci = jax.lax.broadcasted_iota(jnp.int32, (m, m), 1)
    I = (ri == ci).astype(jnp.float32)

    # Landmark pooling for all heads/q/k/v at once: groups of l consecutive tokens.
    # Rows j, j+l, j+2l, ... are element j of every group, so summing the l strided
    # row-slices gives the group sums (== einops reduce('(n l) d -> n d', 'sum') / l).
    land = qkv_ref[pl.ds(0, m, stride=l), :].astype(jnp.float32)
    for j in range(1, l):
        land = land + qkv_ref[pl.ds(j, m, stride=l), :].astype(jnp.float32)
    land = land * inv_l                                            # (m, 3*inner)

    for h in range(heads):  # static unroll; heads are independent work for the MXU
        q = qkv_ref[:, h * D:(h + 1) * D].astype(jnp.float32)                    # (N, D)
        k = qkv_ref[:, inner + h * D:inner + (h + 1) * D].astype(jnp.float32)    # (N, D)
        v = qkv_ref[:, 2 * inner + h * D:2 * inner + (h + 1) * D].astype(jnp.float32)
        q_land = land[:, h * D:(h + 1) * D]                                      # (m, D)
        k_land = land[:, inner + h * D:inner + (h + 1) * D]                      # (m, D)

        sim1 = jnp.dot(q, k_land.T, preferred_element_type=jnp.float32)          # (N, m)
        sim2 = jnp.dot(q_land, k_land.T, preferred_element_type=jnp.float32)     # (m, m)
        sim3 = jnp.dot(q_land, k.T, preferred_element_type=jnp.float32)          # (m, N)

        attn1 = _softmax_last(sim1)
        attn2 = _softmax_last(sim2)
        attn3 = _softmax_last(sim3)

        # Moore-Penrose iterative pseudo-inverse of attn2.
        # (Init scaling uses the per-(batch, head) max rather than PyTorch's global
        #  max over all batches/heads; the iteration converges to the same pinv.)
        abs_x = jnp.abs(attn2)
        col = jnp.sum(abs_x, axis=-1)
        row = jnp.sum(abs_x, axis=-2)
        z = attn2.T / (jnp.max(col) * jnp.max(row))
        for _ in range(iters):  # iters is static -> unrolled at trace time
            xz = jnp.dot(attn2, z, preferred_element_type=jnp.float32)
            t = 7.0 * I - xz
            t = 15.0 * I - jnp.dot(xz, t, preferred_element_type=jnp.float32)
            t = 13.0 * I - jnp.dot(xz, t, preferred_element_type=jnp.float32)
            z = 0.25 * jnp.dot(z, t, preferred_element_type=jnp.float32)

        # out_h = (attn1 @ attn2_inv) @ (attn3 @ v)  -- same association as PyTorch.
        t1 = jnp.dot(attn1, z, preferred_element_type=jnp.float32)    # (N, m)
        t2 = jnp.dot(attn3, v, preferred_element_type=jnp.float32)    # (m, D)
        out_h = jnp.dot(t1, t2, preferred_element_type=jnp.float32)   # (N, D)
        o_ref[:, h * D:(h + 1) * D] = out_h.astype(o_ref.dtype)


def _linear_kernel(x_ref, w_ref, o_ref):
    o_ref[...] = jnp.dot(
        x_ref[...], w_ref[...], preferred_element_type=jnp.float32
    ).astype(o_ref.dtype)


def _linear_bias_kernel(x_ref, w_ref, b_ref, o_ref):
    acc = jnp.dot(x_ref[...], w_ref[...], preferred_element_type=jnp.float32)
    o_ref[...] = (acc + b_ref[...].astype(jnp.float32)).astype(o_ref.dtype)


def _linear_pallas(x, w, bias=None, *, block_m=256):
    """y = x @ w (+ bias). x: (M, K), w: (K, N). Row-tiled & pipelined over M."""
    M, K = x.shape
    _, N = w.shape
    tm = M if M <= block_m else block_m
    Mp = pl.cdiv(M, tm) * tm
    if Mp != M:
        x = jnp.pad(x, ((0, Mp - M), (0, 0)))

    x_spec = pl.BlockSpec((tm, K), lambda i: (i, 0))
    w_spec = pl.BlockSpec((K, N), lambda i: (0, 0))   # weight block stays resident
    o_spec = pl.BlockSpec((tm, N), lambda i: (i, 0))
    params = pltpu.CompilerParams(dimension_semantics=("parallel",))

    if bias is None:
        out = pl.pallas_call(
            _linear_kernel,
            grid=(Mp // tm,),
            in_specs=[x_spec, w_spec],
            out_specs=o_spec,
            out_shape=jax.ShapeDtypeStruct((Mp, N), x.dtype),
            compiler_params=params,
        )(x, w)
    else:
        b_spec = pl.BlockSpec((1, N), lambda i: (0, 0))
        out = pl.pallas_call(
            _linear_bias_kernel,
            grid=(Mp // tm,),
            in_specs=[x_spec, w_spec, b_spec],
            out_specs=o_spec,
            out_shape=jax.ShapeDtypeStruct((Mp, N), x.dtype),
            compiler_params=params,
        )(x, w, bias.reshape(1, N))
    return out[:M] if Mp != M else out


# ----------------------------------------------------------------------------
# Module-equivalent forward
# ----------------------------------------------------------------------------
def attention_forward(x, w_qkv, w_out, b_out, *, heads, dim_head,
                      num_landmarks, pinv_iterations, eps):
    b, n, dim = x.shape
    m = num_landmarks
    inner = heads * dim_head
    project_out = not (heads == 1 and dim_head == dim)

    # F.pad(x, (0, 0, padding, 0)): pad the *front* of the sequence axis.
    remainder = n % m
    if remainder > 0:
        x = jnp.pad(x, ((0, 0), (m - remainder, 0), (0, 0)))
    N = x.shape[1]
    l = math.ceil(n / m)   # == N // m

    # Fold softmax scale into the q rows of w_qkv (Linear has no bias -> exact).
    scale = dim_head ** -0.5
    w_eff = jnp.concatenate([w_qkv[:inner] * scale, w_qkv[inner:]], axis=0)

    # qkv projection (row-tiled Pallas matmul). PyTorch Linear: y = x @ W.T
    qkv = _linear_pallas(x.reshape(b * N, dim), w_eff.T).reshape(b, N, 3 * inner)

    # Nystrom attention: one grid step per batch element, all heads fused in-kernel,
    # output written directly in 'b n (h d)' layout (no XLA transposes).
    kern = partial(_nystrom_attn_kernel, heads=heads, dim_head=dim_head,
                   m=m, l=l, iters=pinv_iterations)
    out = pl.pallas_call(
        kern,
        grid=(b,),
        in_specs=[pl.BlockSpec((None, N, 3 * inner), lambda i: (i, 0, 0))],
        out_specs=pl.BlockSpec((None, N, inner), lambda i: (i, 0, 0)),
        out_shape=jax.ShapeDtypeStruct((b, N, inner), qkv.dtype),
        compiler_params=pltpu.CompilerParams(dimension_semantics=("parallel",)),
    )(qkv)

    # Strip the left padding BEFORE the output projection (to_out is position-wise,
    # so this is equivalent to the reference's out[:, -n:] and does less work).
    out = out[:, N - n:, :]

    if not project_out:
        return out  # nn.Identity()

    # to_out: Linear(inner, dim) with the bias fused into the matmul kernel
    # (+ eval-mode Dropout == identity).
    out2d = _linear_pallas(out.reshape(b * n, inner), w_out.T, bias=b_out)
    return out2d.reshape(b, n, dim)


# ----------------------------------------------------------------------------
# Demo
# ----------------------------------------------------------------------------
if __name__ == "__main__":
    dim = 32
    heads = 2
    dim_head = 16
    num_landmarks = 8
    pinv_iterations = 6
    eps = 1e-8

    b, n = 2, 12  # n % num_landmarks != 0 -> exercises front padding
    inner = heads * dim_head

    key = jax.random.PRNGKey(0)
    kx, kqkv, kout = jax.random.split(key, 3)

    x = jax.random.normal(kx, (b, n, dim), dtype=jnp.float32)
    # PyTorch Linear weight layout: (out_features, in_features)
    w_qkv = 0.02 * jax.random.normal(kqkv, (3 * inner, dim), dtype=jnp.float32)
    w_out = 0.02 * jax.random.normal(kout, (dim, inner), dtype=jnp.float32)
    b_out = jnp.zeros((dim,), dtype=jnp.float32)

    fwd = jax.jit(partial(attention_forward, heads=heads, dim_head=dim_head,
                          num_landmarks=num_landmarks,
                          pinv_iterations=pinv_iterations, eps=eps))
    out = fwd(x, w_qkv, w_out, b_out)
    jax.block_until_ready(out)
    assert out.shape == (b, n, dim)
    print("KERNEL_OK")
</pallas_src>

<mosaic_0001>
module attributes {stable_mosaic.version = 11 : i64} {
  func.func @_linear_kernel(%arg0: i32, %arg1: memref<32x32xf32, #tpu.memory_space<vmem>>, %arg2: memref<32x96xf32, #tpu.memory_space<vmem>>, %arg3: memref<32x96xf32, #tpu.memory_space<vmem>>) attributes {dimension_semantics = [#tpu.dimension_semantics<parallel>], iteration_bounds = array<i64: 1>, scalar_prefetch = 0 : i64, scratch_operands = 0 : i64, tpu.core_type = #tpu.core_type<tc>, window_params = [{transform_indices = @transform_0, window_bounds = array<i64: 32, 32>}, {pipeline_mode = #tpu.pipeline_mode<synchronous>, transform_indices = @transform_1, window_bounds = array<i64: 32, 96>}, {transform_indices = @transform_2, window_bounds = array<i64: 32, 96>}]} {
    %c0 = arith.constant 0 : index
    %c0_0 = arith.constant 0 : index
    %0 = vector.load %arg1[%c0, %c0_0] : memref<32x32xf32, #tpu.memory_space<vmem>>, vector<32x32xf32>
    %c0_1 = arith.constant 0 : index
    %c0_2 = arith.constant 0 : index
    %1 = vector.load %arg2[%c0_1, %c0_2] : memref<32x96xf32, #tpu.memory_space<vmem>>, vector<32x96xf32>
    %cst = arith.constant dense<0.000000e+00> : vector<32x96xf32>
    %2 = tpu.matmul %0, %1, %cst {dimension_numbers = #tpu.dot_dimension_numbers<[1], [0], [0], [1], [0, 0, 1, 1], [], []>} : vector<32x32xf32>, vector<32x96xf32>, vector<32x96xf32> -> vector<32x96xf32>
    %c0_3 = arith.constant 0 : index
    %c0_4 = arith.constant 0 : index
    %3 = vector.load %arg3[%c0_3, %c0_4] : memref<32x96xf32, #tpu.memory_space<vmem>>, vector<32x96xf32>
    tpu.vector_store %arg3[%c0_3, %c0_4], %2 {strides = array<i32>} : memref<32x96xf32, #tpu.memory_space<vmem>>, vector<32x96xf32>,
    return
  }
  func.func @transform_0(%arg0: i32) -> (i32, i32) {
    %c0_i32 = arith.constant 0 : i32
    %c0_i32_0 = arith.constant 0 : i32
    return %arg0, %c0_i32 : i32, i32
  }
  func.func @transform_1(%arg0: i32) -> (i32, i32) {
    %c0_i32 = arith.constant 0 : i32
    %c0_i32_0 = arith.constant 0 : i32
    %c0_i32_1 = arith.constant 0 : i32
    return %c0_i32, %c0_i32_0 : i32, i32
  }
  func.func @transform_2(%arg0: i32) -> (i32, i32) {
    %c0_i32 = arith.constant 0 : i32
    %c0_i32_0 = arith.constant 0 : i32
    return %arg0, %c0_i32 : i32, i32
  }
}

module attributes {stable_mosaic.version = 11 : i64} {
  func.func @_nystrom_attn_kernel(%arg0: i32, %arg1: memref<1x16x96xf32, #tpu.memory_space<vmem>>, %arg2: memref<1x16x32xf32, #tpu.memory_space<vmem>>) attributes {dimension_semantics = [#tpu.dimension_semantics<parallel>], iteration_bounds = array<i64: 2>, scalar_prefetch = 0 : i64, scratch_operands = 0 : i64, tpu.core_type = #tpu.core_type<tc>, window_params = [{transform_indices = @transform_0, window_bounds = array<i64: 1, 16, 96>}, {transform_indices = @transform_1, window_bounds = array<i64: 1, 16, 32>}]} {
    %0 = tpu.iota {dimensions = array<i32: 0>} : vector<8x8xi32>
    %1 = tpu.iota {dimensions = array<i32: 1>} : vector<8x8xi32>
    %2 = arith.cmpi eq, %0, %1 : vector<8x8xi32>
    %3 = arith.extui %2 : vector<8x8xi1> to vector<8x8xi32>
    %4 = arith.sitofp %3 : vector<8x8xi32> to vector<8x8xf32>
    %c0 = arith.constant 0 : index
    %c0_0 = arith.constant 0 : index
    %c0_1 = arith.constant 0 : index
    %5 = tpu.strided_load %arg1[%c0, %c0_0, %c0_1] {strides = array<i32: 1, 2, 1>} : memref<1x16x96xf32, #tpu.memory_space<vmem>>, vector<1x8x96xf32>
    %6 = vector.shape_cast %5 : vector<1x8x96xf32> to vector<8x96xf32>
    %c0_2 = arith.constant 0 : index
    %c1 = arith.constant 1 : index
    %c0_3 = arith.constant 0 : index
    %7 = tpu.strided_load %arg1[%c0_2, %c1, %c0_3] {strides = array<i32: 1, 2, 1>} : memref<1x16x96xf32, #tpu.memory_space<vmem>>, vector<1x8x96xf32>
    %8 = vector.shape_cast %7 : vector<1x8x96xf32> to vector<8x96xf32>
    %9 = arith.addf %6, %8 : vector<8x96xf32>
    %cst = arith.constant 5.000000e-01 : f32
    %10 = vector.broadcast %cst : f32 to vector<8x96xf32>
    %11 = arith.mulf %9, %10 : vector<8x96xf32>
    %c0_4 = arith.constant 0 : index
    %c0_5 = arith.constant 0 : index
    %c0_6 = arith.constant 0 : index
    %12 = vector.load %arg1[%c0_4, %c0_5, %c0_6] : memref<1x16x96xf32, #tpu.memory_space<vmem>>, vector<1x16x16xf32>
    %13 = vector.shape_cast %12 : vector<1x16x16xf32> to vector<16x16xf32>
    %c0_7 = arith.constant 0 : index
    %c0_8 = arith.constant 0 : index
    %c32 = arith.constant 32 : index
    %14 = vector.load %arg1[%c0_7, %c0_8, %c32] : memref<1x16x96xf32, #tpu.memory_space<vmem>>, vector<1x16x16xf32>
    %15 = vector.shape_cast %14 : vector<1x16x16xf32> to vector<16x16xf32>
    %c0_9 = arith.constant 0 : index
    %c0_10 = arith.constant 0 : index
    %c64 = arith.constant 64 : index
    %16 = vector.load %arg1[%c0_9, %c0_10, %c64] : memref<1x16x96xf32, #tpu.memory_space<vmem>>, vector<1x16x16xf32>
    %17 = vector.shape_cast %16 : vector<1x16x16xf32> to vector<16x16xf32>
    %18 = vector.extract_strided_slice %11 {offsets = [0, 0], sizes = [8, 16], strides = [1, 1]} : vector<8x96xf32> to vector<8x16xf32>
    %19 = vector.extract_strided_slice %11 {offsets = [0, 32], sizes = [8, 16], strides = [1, 1]} : vector<8x96xf32> to vector<8x16xf32>
    %20 = tpu.transpose %19, [1, 0] : vector<8x16xf32> -> vector<16x8xf32>
    %cst_11 = arith.constant dense<0.000000e+00> : vector<16x8xf32>
    %21 = tpu.matmul %13, %20, %cst_11 {dimension_numbers = #tpu.dot_dimension_numbers<[1], [0], [0], [1], [0, 0, 1, 1], [], []>} : vector<16x16xf32>, vector<16x8xf32>, vector<16x8xf32> -> vector<16x8xf32>
    %22 = tpu.transpose %19, [1, 0] : vector<8x16xf32> -> vector<16x8xf32>
    %cst_12 = arith.constant dense<0.000000e+00> : vector<8x8xf32>
    %23 = tpu.matmul %18, %22, %cst_12 {dimension_numbers = #tpu.dot_dimension_numbers<[1], [0], [0], [1], [0, 0, 1, 1], [], []>} : vector<8x16xf32>, vector<16x8xf32>, vector<8x8xf32> -> vector<8x8xf32>
    %24 = tpu.transpose %15, [1, 0] : vector<16x16xf32> -> vector<16x16xf32>
    %cst_13 = arith.constant dense<0.000000e+00> : vector<8x16xf32>
    %25 = tpu.matmul %18, %24, %cst_13 {dimension_numbers = #tpu.dot_dimension_numbers<[1], [0], [0], [1], [0, 0, 1, 1], [], []>} : vector<8x16xf32>, vector<16x16xf32>, vector<8x16xf32> -> vector<8x16xf32>
    %cst_14 = arith.constant dense<0xFF800000> : vector<16xf32>
    %26 = vector.multi_reduction <maximumf>, %21, %cst_14 [1] : vector<16x8xf32> to vector<16xf32>
    %27 = vector.shape_cast %26 : vector<16xf32> to vector<16x1xf32>
    %28 = vector.broadcast %27 : vector<16x1xf32> to vector<16x8xf32>
    %29 = arith.subf %21, %28 : vector<16x8xf32>
    %30 = math.exp %29 : vector<16x8xf32>
    %cst_15 = arith.constant dense<0.000000e+00> : vector<16xf32>
    %31 = vector.multi_reduction <add>, %30, %cst_15 [1] : vector<16x8xf32> to vector<16xf32>
    %32 = vector.shape_cast %31 : vector<16xf32> to vector<16x1xf32>
    %33 = vector.broadcast %32 : vector<16x1xf32> to vector<16x8xf32>
    %34 = arith.divf %30, %33 : vector<16x8xf32>
    %cst_16 = arith.constant dense<0xFF800000> : vector<8xf32>
    %35 = vector.multi_reduction <maximumf>, %23, %cst_16 [1] : vector<8x8xf32> to vector<8xf32>
    %36 = vector.shape_cast %35 : vector<8xf32> to vector<8x1xf32>
    %37 = vector.broadcast %36 : vector<8x1xf32> to vector<8x8xf32>
    %38 = arith.subf %23, %37 : vector<8x8xf32>
    %39 = math.exp %38 : vector<8x8xf32>
    %cst_17 = arith.constant dense<0.000000e+00> : vector<8xf32>
    %40 = vector.multi_reduction <add>, %39, %cst_17 [1] : vector<8x8xf32> to vector<8xf32>
    %41 = vector.shape_cast %40 : vector<8xf32> to vector<8x1xf32>
    %42 = vector.broadcast %41 : vector<8x1xf32> to vector<8x8xf32>
    %43 = arith.divf %39, %42 : vector<8x8xf32>
    %cst_18 = arith.constant dense<0xFF800000> : vector<8xf32>
    %44 = vector.multi_reduction <maximumf>, %25, %cst_18 [1] : vector<8x16xf32> to vector<8xf32>
    %45 = vector.shape_cast %44 : vector<8xf32> to vector<8x1xf32>
    %46 = vector.broadcast %45 : vector<8x1xf32> to vector<8x16xf32>
    %47 = arith.subf %25, %46 : vector<8x16xf32>
    %48 = math.exp %47 : vector<8x16xf32>
    %cst_19 = arith.constant dense<0.000000e+00> : vector<8xf32>
    %49 = vector.multi_reduction <add>, %48, %cst_19 [1] : vector<8x16xf32> to vector<8xf32>
    %50 = vector.shape_cast %49 : vector<8xf32> to vector<8x1xf32>
    %51 = vector.broadcast %50 : vector<8x1xf32> to vector<8x16xf32>
    %52 = arith.divf %48, %51 : vector<8x16xf32>
    %53 = math.absf %43 : vector<8x8xf32>
    %cst_20 = arith.constant dense<0.000000e+00> : vector<8xf32>
    %54 = vector.multi_reduction <add>, %53, %cst_20 [1] : vector<8x8xf32> to vector<8xf32>
    %cst_21 = arith.constant dense<0.000000e+00> : vector<8xf32>
    %55 = vector.multi_reduction <add>, %53, %cst_21 [0] : vector<8x8xf32> to vector<8xf32>
    %56 = tpu.transpose %43, [1, 0] : vector<8x8xf32> -> vector<8x8xf32>
    %57 = vector.shape_cast %54 : vector<8xf32> to vector<1x8xf32>
    %cst_22 = arith.constant dense<0xFF800000> : vector<1xf32>
    %58 = vector.multi_reduction <maximumf>, %57, %cst_22 [1] : vector<1x8xf32> to vector<1xf32>
    %59 = vector.shape_cast %58 : vector<1xf32> to vector<1x1xf32>
    %60 = vector.extract %59[0, 0] : f32 from vector<1x1xf32>
    %61 = vector.shape_cast %55 : vector<8xf32> to vector<1x8xf32>
    %cst_23 = arith.constant dense<0xFF800000> : vector<1xf32>
    %62 = vector.multi_reduction <maximumf>, %61, %cst_23 [1] : vector<1x8xf32> to vector<1xf32>
    %63 = vector.shape_cast %62 : vector<1xf32> to vector<1x1xf32>
    %64 = vector.extract %63[0, 0] : f32 from vector<1x1xf32>
    %65 = arith.mulf %60, %64 : f32
    %66 = vector.broadcast %65 : f32 to vector<8x8xf32>
    %67 = arith.divf %56, %66 : vector<8x8xf32>
    %cst_24 = arith.constant dense<0.000000e+00> : vector<8x8xf32>
    %68 = tpu.matmul %43, %67, %cst_24 {dimension_numbers = #tpu.dot_dimension_numbers<[1], [0], [0], [1], [0, 0, 1, 1], [], []>} : vector<8x8xf32>, vector<8x8xf32>, vector<8x8xf32> -> vector<8x8xf32>
    %cst_25 = arith.constant 7.000000e+00 : f32
    %69 = vector.broadcast %cst_25 : f32 to vector<8x8xf32>
    %70 = arith.mulf %69, %4 : vector<8x8xf32>
    %71 = arith.subf %70, %68 : vector<8x8xf32>
    %cst_26 = arith.constant 1.500000e+01 : f32
    %72 = vector.broadcast %cst_26 : f32 to vector<8x8xf32>
    %73 = arith.mulf %72, %4 : vector<8x8xf32>
    %cst_27 = arith.constant dense<0.000000e+00> : vector<8x8xf32>
    %74 = tpu.matmul %68, %71, %cst_27 {dimension_numbers = #tpu.dot_dimension_numbers<[1], [0], [0], [1], [0, 0, 1, 1], [], []>} : vector<8x8xf32>, vector<8x8xf32>, vector<8x8xf32> -> vector<8x8xf32>
    %75 = arith.subf %73, %74 : vector<8x8xf32>
    %cst_28 = arith.constant 1.300000e+01 : f32
    %76 = vector.broadcast %cst_28 : f32 to vector<8x8xf32>
    %77 = arith.mulf %76, %4 : vector<8x8xf32>
    %cst_29 = arith.constant dense<0.000000e+00> : vector<8x8xf32>
    %78 = tpu.matmul %68, %75, %cst_29 {dimension_numbers = #tpu.dot_dimension_numbers<[1], [0], [0], [1], [0, 0, 1, 1], [], []>} : vector<8x8xf32>, vector<8x8xf32>, vector<8x8xf32> -> vector<8x8xf32>
    %79 = arith.subf %77, %78 : vector<8x8xf32>
    %cst_30 = arith.constant dense<0.000000e+00> : vector<8x8xf32>
    %80 = tpu.matmul %67, %79, %cst_30 {dimension_numbers = #tpu.dot_dimension_numbers<[1], [0], [0], [1], [0, 0, 1, 1], [], []>} : vector<8x8xf32>, vector<8x8xf32>, vector<8x8xf32> -> vector<8x8xf32>
    %cst_31 = arith.constant 2.500000e-01 : f32
    %81 = vector.broadcast %cst_31 : f32 to vector<8x8xf32>
    %82 = arith.mulf %81, %80 : vector<8x8xf32>
    %cst_32 = arith.constant dense<0.000000e+00> : vector<8x8xf32>
    %83 = tpu.matmul %43, %82, %cst_32 {dimension_numbers = #tpu.dot_dimension_numbers<[1], [0], [0], [1], [0, 0, 1, 1], [], []>} : vector<8x8xf32>, vector<8x8xf32>, vector<8x8xf32> -> vector<8x8xf32>
    %cst_33 = arith.constant 7.000000e+00 : f32
    %84 = vector.broadcast %cst_33 : f32 to vector<8x8xf32>
    %85 = arith.mulf %84, %4 : vector<8x8xf32>
    %86 = arith.subf %85, %83 : vector<8x8xf32>
    %cst_34 = arith.constant 1.500000e+01 : f32
    %87 = vector.broadcast %cst_34 : f32 to vector<8x8xf32>
    %88 = arith.mulf %87, %4 : vector<8x8xf32>
    %cst_35 = arith.constant dense<0.000000e+00> : vector<8x8xf32>
    %89 = tpu.matmul %83, %86, %cst_35 {dimension_numbers = #tpu.dot_dimension_numbers<[1], [0], [0], [1], [0, 0, 1, 1], [], []>} : vector<8x8xf32>, vector<8x8xf32>, vector<8x8xf32> -> vector<8x8xf32>
    %90 = arith.subf %88, %89 : vector<8x8xf32>
    %cst_36 = arith.constant 1.300000e+01 : f32
    %91 = vector.broadcast %cst_36 : f32 to vector<8x8xf32>
    %92 = arith.mulf %91, %4 : vector<8x8xf32>
    %cst_37 = arith.constant dense<0.000000e+00> : vector<8x8xf32>
    %93 = tpu.matmul %83, %90, %cst_37 {dimension_numbers = #tpu.dot_dimension_numbers<[1], [0], [0], [1], [0, 0, 1, 1], [], []>} : vector<8x8xf32>, vector<8x8xf32>, vector<8x8xf32> -> vector<8x8xf32>
    %94 = arith.subf %92, %93 : vector<8x8xf32>
    %cst_38 = arith.constant dense<0.000000e+00> : vector<8x8xf32>
    %95 = tpu.matmul %82, %94, %cst_38 {dimension_numbers = #tpu.dot_dimension_numbers<[1], [0], [0], [1], [0, 0, 1, 1], [], []>} : vector<8x8xf32>, vector<8x8xf32>, vector<8x8xf32> -> vector<8x8xf32>
    %cst_39 = arith.constant 2.500000e-01 : f32
    %96 = vector.broadcast %cst_39 : f32 to vector<8x8xf32>
    %97 = arith.mulf %96, %95 : vector<8x8xf32>
    %cst_40 = arith.constant dense<0.000000e+00> : vector<8x8xf32>
    %98 = tpu.matmul %43, %97, %cst_40 {dimension_numbers = #tpu.dot_dimension_numbers<[1], [0], [0], [1], [0, 0, 1, 1], [], []>} : vector<8x8xf32>, vector<8x8xf32>, vector<8x8xf32> -> vector<8x8xf32>
    %cst_41 = arith.constant 7.000000e+00 : f32
    %99 = vector.broadcast %cst_41 : f32 to vector<8x8xf32>
    %100 = arith.mulf %99, %4 : vector<8x8xf32>
    %101 = arith.subf %100, %98 : vector<8x8xf32>
    %cst_42 = arith.constant 1.500000e+01 : f32
    %102 = vector.broadcast %cst_42 : f32 to vector<8x8xf32>
    %103 = arith.mulf %102, %4 : vector<8x8xf32>
    %cst_43 = arith.constant dense<0.000000e+00> : vector<8x8xf32>
    %104 = tpu.matmul %98, %101, %cst_43 {dimension_numbers = #tpu.dot_dimension_numbers<[1], [0], [0], [1], [0, 0, 1, 1], [], []>} : vector<8x8xf32>, vector<8x8xf32>, vector<8x8xf32> -> vector<8x8xf32>
    %105 = arith.subf %103, %104 : vector<8x8xf32>
    %cst_44 = arith.constant 1.300000e+01 : f32
    %106 = vector.broadcast %cst_44 : f32 to vector<8x8xf32>
    %107 = arith.mulf %106, %4 : vector<8x8xf32>
    %cst_45 = arith.constant dense<0.000000e+00> : vector<8x8xf32>
    %108 = tpu.matmul %98, %105, %cst_45 {dimension_numbers = #tpu.dot_dimension_numbers<[1], [0], [0], [1], [0, 0, 1, 1], [], []>} : vector<8x8xf32>, vector<8x8xf32>, vector<8x8xf32> -> vector<8x8xf32>
    %109 = arith.subf %107, %108 : vector<8x8xf32>
    %cst_46 = arith.constant dense<0.000000e+00> : vector<8x8xf32>
    %110 = tpu.matmul %97, %109, %cst_46 {dimension_numbers = #tpu.dot_dimension_numbers<[1], [0], [0], [1], [0, 0, 1, 1], [], []>} : vector<8x8xf32>, vector<8x8xf32>, vector<8x8xf32> -> vector<8x8xf32>
    %cst_47 = arith.constant 2.500000e-01 : f32
    %111 = vector.broadcast %cst_47 : f32 to vector<8x8xf32>
    %112 = arith.mulf %111, %110 : vector<8x8xf32>
    %cst_48 = arith.constant dense<0.000000e+00> : vector<8x8xf32>
    %113 = tpu.matmul %43, %112, %cst_48 {dimension_numbers = #tpu.dot_dimension_numbers<[1], [0], [0], [1], [0, 0, 1, 1], [], []>} : vector<8x8xf32>, vector<8x8xf32>, vector<8x8xf32> -> vector<8x8xf32>
    %cst_49 = arith.constant 7.000000e+00 : f32
    %114 = vector.broadcast %cst_49 : f32 to vector<8x8xf32>
    %115 = arith.mulf %114, %4 : vector<8x8xf32>
    %116 = arith.subf %115, %113 : vector<8x8xf32>
    %cst_50 = arith.constant 1.500000e+01 : f32
    %117 = vector.broadcast %cst_50 : f32 to vector<8x8xf32>
    %118 = arith.mulf %117, %4 : vector<8x8xf32>
    %cst_51 = arith.constant dense<0.000000e+00> : vector<8x8xf32>
    %119 = tpu.matmul %113, %116, %cst_51 {dimension_numbers = #tpu.dot_dimension_numbers<[1], [0], [0], [1], [0, 0, 1, 1], [], []>} : vector<8x8xf32>, vector<8x8xf32>, vector<8x8xf32> -> vector<8x8xf32>
    %120 = arith.subf %118, %119 : vector<8x8xf32>
    %cst_52 = arith.constant 1.300000e+01 : f32
    %121 = vector.broadcast %cst_52 : f32 to vector<8x8xf32>
    %122 = arith.mulf %121, %4 : vector<8x8xf32>
    %cst_53 = arith.constant dense<0.000000e+00> : vector<8x8xf32>
    %123 = tpu.matmul %113, %120, %cst_53 {dimension_numbers = #tpu.dot_dimension_numbers<[1], [0], [0], [1], [0, 0, 1, 1], [], []>} : vector<8x8xf32>, vector<8x8xf32>, vector<8x8xf32> -> vector<8x8xf32>
    %124 = arith.subf %122, %123 : vector<8x8xf32>
    %cst_54 = arith.constant dense<0.000000e+00> : vector<8x8xf32>
    %125 = tpu.matmul %112, %124, %cst_54 {dimension_numbers = #tpu.dot_dimension_numbers<[1], [0], [0], [1], [0, 0, 1, 1], [], []>} : vector<8x8xf32>, vector<8x8xf32>, vector<8x8xf32> -> vector<8x8xf32>
    %cst_55 = arith.constant 2.500000e-01 : f32
    %126 = vector.broadcast %cst_55 : f32 to vector<8x8xf32>
    %127 = arith.mulf %126, %125 : vector<8x8xf32>
    %cst_56 = arith.constant dense<0.000000e+00> : vector<8x8xf32>
    %128 = tpu.matmul %43, %127, %cst_56 {dimension_numbers = #tpu.dot_dimension_numbers<[1], [0], [0], [1], [0, 0, 1, 1], [], []>} : vector<8x8xf32>, vector<8x8xf32>, vector<8x8xf32> -> vector<8x8xf32>
    %cst_57 = arith.constant 7.000000e+00 : f32
    %129 = vector.broadcast %cst_57 : f32 to vector<8x8xf32>
    %130 = arith.mulf %129, %4 : vector<8x8xf32>
    %131 = arith.subf %130, %128 : vector<8x8xf32>
    %cst_58 = arith.constant 1.500000e+01 : f32
    %132 = vector.broadcast %cst_58 : f32 to vector<8x8xf32>
    %133 = arith.mulf %132, %4 : vector<8x8xf32>
    %cst_59 = arith.constant dense<0.000000e+00> : vector<8x8xf32>
    %134 = tpu.matmul %128, %131, %cst_59 {dimension_numbers = #tpu.dot_dimension_numbers<[1], [0], [0], [1], [0, 0, 1, 1], [], []>} : vector<8x8xf32>, vector<8x8xf32>, vector<8x8xf32> -> vector<8x8xf32>
    %135 = arith.subf %133, %134 : vector<8x8xf32>
    %cst_60 = arith.constant 1.300000e+01 : f32
    %136 = vector.broadcast %cst_60 : f32 to vector<8x8xf32>
    %137 = arith.mulf %136, %4 : vector<8x8xf32>
    %cst_61 = arith.constant dense<0.000000e+00> : vector<8x8xf32>
    %138 = tpu.matmul %128, %135, %cst_61 {dimension_numbers = #tpu.dot_dimension_numbers<[1], [0], [0], [1], [0, 0, 1, 1], [], []>} : vector<8x8xf32>, vector<8x8xf32>, vector<8x8xf32> -> vector<8x8xf32>
    %139 = arith.subf %137, %138 : vector<8x8xf32>
    %cst_62 = arith.constant dense<0.000000e+00> : vector<8x8xf32>
    %140 = tpu.matmul %127, %139, %cst_62 {dimension_numbers = #tpu.dot_dimension_numbers<[1], [0], [0], [1], [0, 0, 1, 1], [], []>} : vector<8x8xf32>, vector<8x8xf32>, vector<8x8xf32> -> vector<8x8xf32>
    %cst_63 = arith.constant 2.500000e-01 : f32
    %141 = vector.broadcast %cst_63 : f32 to vector<8x8xf32>
    %142 = arith.mulf %141, %140 : vector<8x8xf32>
    %cst_64 = arith.constant dense<0.000000e+00> : vector<8x8xf32>
    %143 = tpu.matmul %43, %142, %cst_64 {dimension_numbers = #tpu.dot_dimension_numbers<[1], [0], [0], [1], [0, 0, 1, 1], [], []>} : vector<8x8xf32>, vector<8x8xf32>, vector<8x8xf32> -> vector<8x8xf32>
    %cst_65 = arith.constant 7.000000e+00 : f32
    %144 = vector.broadcast %cst_65 : f32 to vector<8x8xf32>
    %145 = arith.mulf %144, %4 : vector<8x8xf32>
    %146 = arith.subf %145, %143 : vector<8x8xf32>
    %cst_66 = arith.constant 1.500000e+01 : f32
    %147 = vector.broadcast %cst_66 : f32 to vector<8x8xf32>
    %148 = arith.mulf %147, %4 : vector<8x8xf32>
    %cst_67 = arith.constant dense<0.000000e+00> : vector<8x8xf32>
    %149 = tpu.matmul %143, %146, %cst_67 {dimension_numbers = #tpu.dot_dimension_numbers<[1], [0], [0], [1], [0, 0, 1, 1], [], []>} : vector<8x8xf32>, vector<8x8xf32>, vector<8x8xf32> -> vector<8x8xf32>
    %150 = arith.subf %148, %149 : vector<8x8xf32>
    %cst_68 = arith.constant 1.300000e+01 : f32
    %151 = vector.broadcast %cst_68 : f32 to vector<8x8xf32>
    %152 = arith.mulf %151, %4 : vector<8x8xf32>
    %cst_69 = arith.constant dense<0.000000e+00> : vector<8x8xf32>
    %153 = tpu.matmul %143, %150, %cst_69 {dimension_numbers = #tpu.dot_dimension_numbers<[1], [0], [0], [1], [0, 0, 1, 1], [], []>} : vector<8x8xf32>, vector<8x8xf32>, vector<8x8xf32> -> vector<8x8xf32>
    %154 = arith.subf %152, %153 : vector<8x8xf32>
    %cst_70 = arith.constant dense<0.000000e+00> : vector<8x8xf32>
    %155 = tpu.matmul %142, %154, %cst_70 {dimension_numbers = #tpu.dot_dimension_numbers<[1], [0], [0], [1], [0, 0, 1, 1], [], []>} : vector<8x8xf32>, vector<8x8xf32>, vector<8x8xf32> -> vector<8x8xf32>
    %cst_71 = arith.constant 2.500000e-01 : f32
    %156 = vector.broadcast %cst_71 : f32 to vector<8x8xf32>
    %157 = arith.mulf %156, %155 : vector<8x8xf32>
    %cst_72 = arith.constant dense<0.000000e+00> : vector<16x8xf32>
    %158 = tpu.matmul %34, %157, %cst_72 {dimension_numbers = #tpu.dot_dimension_numbers<[1], [0], [0], [1], [0, 0, 1, 1], [], []>} : vector<16x8xf32>, vector<8x8xf32>, vector<16x8xf32> -> vector<16x8xf32>
    %cst_73 = arith.constant dense<0.000000e+00> : vector<8x16xf32>
    %159 = tpu.matmul %52, %17, %cst_73 {dimension_numbers = #tpu.dot_dimension_numbers<[1], [0], [0], [1], [0, 0, 1, 1], [], []>} : vector<8x16xf32>, vector<16x16xf32>, vector<8x16xf32> -> vector<8x16xf32>
    %cst_74 = arith.constant dense<0.000000e+00> : vector<16x16xf32>
    %160 = tpu.matmul %158, %159, %cst_74 {dimension_numbers = #tpu.dot_dimension_numbers<[1], [0], [0], [1], [0, 0, 1, 1], [], []>} : vector<16x8xf32>, vector<8x16xf32>, vector<16x16xf32> -> vector<16x16xf32>
    %c0_75 = arith.constant 0 : index
    %c0_76 = arith.constant 0 : index
    %c0_77 = arith.constant 0 : index
    %161 = vector.load %arg2[%c0_75, %c0_76, %c0_77] : memref<1x16x32xf32, #tpu.memory_space<vmem>>, vector<1x16x16xf32>
    %162 = vector.shape_cast %161 : vector<1x16x16xf32> to vector<16x16xf32>
    %163 = vector.shape_cast %160 : vector<16x16xf32> to vector<1x16x16xf32>
    tpu.vector_store %arg2[%c0_75, %c0_76, %c0_77], %163 {strides = array<i32>} : memref<1x16x32xf32, #tpu.memory_space<vmem>>, vector<1x16x16xf32>,
    %c0_78 = arith.constant 0 : index
    %c0_79 = arith.constant 0 : index
    %c16 = arith.constant 16 : index
    %164 = vector.load %arg1[%c0_78, %c0_79, %c16] : memref<1x16x96xf32, #tpu.memory_space<vmem>>, vector<1x16x16xf32>
    %165 = vector.shape_cast %164 : vector<1x16x16xf32> to vector<16x16xf32>
    %c0_80 = arith.constant 0 : index
    %c0_81 = arith.constant 0 : index
    %c48 = arith.constant 48 : index
    %166 = vector.load %arg1[%c0_80, %c0_81, %c48] : memref<1x16x96xf32, #tpu.memory_space<vmem>>, vector<1x16x16xf32>
    %167 = vector.shape_cast %166 : vector<1x16x16xf32> to vector<16x16xf32>
    %c0_82 = arith.constant 0 : index
    %c0_83 = arith.constant 0 : index
    %c80 = arith.constant 80 : index
    %168 = vector.load %arg1[%c0_82, %c0_83, %c80] : memref<1x16x96xf32, #tpu.memory_space<vmem>>, vector<1x16x16xf32>
    %169 = vector.shape_cast %168 : vector<1x16x16xf32> to vector<16x16xf32>
    %170 = vector.extract_strided_slice %11 {offsets = [0, 16], sizes = [8, 16], strides = [1, 1]} : vector<8x96xf32> to vector<8x16xf32>
    %171 = vector.extract_strided_slice %11 {offsets = [0, 48], sizes = [8, 16], strides = [1, 1]} : vector<8x96xf32> to vector<8x16xf32>
    %172 = tpu.transpose %171, [1, 0] : vector<8x16xf32> -> vector<16x8xf32>
    %cst_84 = arith.constant dense<0.000000e+00> : vector<16x8xf32>
    %173 = tpu.matmul %165, %172, %cst_84 {dimension_numbers = #tpu.dot_dimension_numbers<[1], [0], [0], [1], [0, 0, 1, 1], [], []>} : vector<16x16xf32>, vector<16x8xf32>, vector<16x8xf32> -> vector<16x8xf32>
    %174 = tpu.transpose %171, [1, 0] : vector<8x16xf32> -> vector<16x8xf32>
    %cst_85 = arith.constant dense<0.000000e+00> : vector<8x8xf32>
    %175 = tpu.matmul %170, %174, %cst_85 {dimension_numbers = #tpu.dot_dimension_numbers<[1], [0], [0], [1], [0, 0, 1, 1], [], []>} : vector<8x16xf32>, vector<16x8xf32>, vector<8x8xf32> -> vector<8x8xf32>
    %176 = tpu.transpose %167, [1, 0] : vector<16x16xf32> -> vector<16x16xf32>
    %cst_86 = arith.constant dense<0.000000e+00> : vector<8x16xf32>
    %177 = tpu.matmul %170, %176, %cst_86 {dimension_numbers = #tpu.dot_dimension_numbers<[1], [0], [0], [1], [0, 0, 1, 1], [], []>} : vector<8x16xf32>, vector<16x16xf32>, vector<8x16xf32> -> vector<8x16xf32>
    %cst_87 = arith.constant dense<0xFF800000> : vector<16xf32>
    %178 = vector.multi_reduction <maximumf>, %173, %cst_87 [1] : vector<16x8xf32> to vector<16xf32>
    %179 = vector.shape_cast %178 : vector<16xf32> to vector<16x1xf32>
    %180 = vector.broadcast %179 : vector<16x1xf32> to vector<16x8xf32>
    %181 = arith.subf %173, %180 : vector<16x8xf32>
    %182 = math.exp %181 : vector<16x8xf32>
    %cst_88 = arith.constant dense<0.000000e+00> : vector<16xf32>
    %183 = vector.multi_reduction <add>, %182, %cst_88 [1] : vector<16x8xf32> to vector<16xf32>
    %184 = vector.shape_cast %183 : vector<16xf32> to vector<16x1xf32>
    %185 = vector.broadcast %184 : vector<16x1xf32> to vector<16x8xf32>
    %186 = arith.divf %182, %185 : vector<16x8xf32>
    %cst_89 = arith.constant dense<0xFF800000> : vector<8xf32>
    %187 = vector.multi_reduction <maximumf>, %175, %cst_89 [1] : vector<8x8xf32> to vector<8xf32>
    %188 = vector.shape_cast %187 : vector<8xf32> to vector<8x1xf32>
    %189 = vector.broadcast %188 : vector<8x1xf32> to vector<8x8xf32>
    %190 = arith.subf %175, %189 : vector<8x8xf32>
    %191 = math.exp %190 : vector<8x8xf32>
    %cst_90 = arith.constant dense<0.000000e+00> : vector<8xf32>
    %192 = vector.multi_reduction <add>, %191, %cst_90 [1] : vector<8x8xf32> to vector<8xf32>
    %193 = vector.shape_cast %192 : vector<8xf32> to vector<8x1xf32>
    %194 = vector.broadcast %193 : vector<8x1xf32> to vector<8x8xf32>
    %195 = arith.divf %191, %194 : vector<8x8xf32>
    %cst_91 = arith.constant dense<0xFF800000> : vector<8xf32>
    %196 = vector.multi_reduction <maximumf>, %177, %cst_91 [1] : vector<8x16xf32> to vector<8xf32>
    %197 = vector.shape_cast %196 : vector<8xf32> to vector<8x1xf32>
    %198 = vector.broadcast %197 : vector<8x1xf32> to vector<8x16xf32>
    %199 = arith.subf %177, %198 : vector<8x16xf32>
    %200 = math.exp %199 : vector<8x16xf32>
    %cst_92 = arith.constant dense<0.000000e+00> : vector<8xf32>
    %201 = vector.multi_reduction <add>, %200, %cst_92 [1] : vector<8x16xf32> to vector<8xf32>
    %202 = vector.shape_cast %201 : vector<8xf32> to vector<8x1xf32>
    %203 = vector.broadcast %202 : vector<8x1xf32> to vector<8x16xf32>
    %204 = arith.divf %200, %203 : vector<8x16xf32>
    %205 = math.absf %195 : vector<8x8xf32>
    %cst_93 = arith.constant dense<0.000000e+00> : vector<8xf32>
    %206 = vector.multi_reduction <add>, %205, %cst_93 [1] : vector<8x8xf32> to vector<8xf32>
    %cst_94 = arith.constant dense<0.000000e+00> : vector<8xf32>
    %207 = vector.multi_reduction <add>, %205, %cst_94 [0] : vector<8x8xf32> to vector<8xf32>
    %208 = tpu.transpose %195, [1, 0] : vector<8x8xf32> -> vector<8x8xf32>
    %209 = vector.shape_cast %206 : vector<8xf32> to vector<1x8xf32>
    %cst_95 = arith.constant dense<0xFF800000> : vector<1xf32>
    %210 = vector.multi_reduction <maximumf>, %209, %cst_95 [1] : vector<1x8xf32> to vector<1xf32>
    %211 = vector.shape_cast %210 : vector<1xf32> to vector<1x1xf32>
    %212 = vector.extract %211[0, 0] : f32 from vector<1x1xf32>
    %213 = vector.shape_cast %207 : vector<8xf32> to vector<1x8xf32>
    %cst_96 = arith.constant dense<0xFF800000> : vector<1xf32>
    %214 = vector.multi_reduction <maximumf>, %213, %cst_96 [1] : vector<1x8xf32> to vector<1xf32>
    %215 = vector.shape_cast %214 : vector<1xf32> to vector<1x1xf32>
    %216 = vector.extract %215[0, 0] : f32 from vector<1x1xf32>
    %217 = arith.mulf %212, %216 : f32
    %218 = vector.broadcast %217 : f32 to vector<8x8xf32>
    %219 = arith.divf %208, %218 : vector<8x8xf32>
    %cst_97 = arith.constant dense<0.000000e+00> : vector<8x8xf32>
    %220 = tpu.matmul %195, %219, %cst_97 {dimension_numbers = #tpu.dot_dimension_numbers<[1], [0], [0], [1], [0, 0, 1, 1], [], []>} : vector<8x8xf32>, vector<8x8xf32>, vector<8x8xf32> -> vector<8x8xf32>
    %cst_98 = arith.constant 7.000000e+00 : f32
    %221 = vector.broadcast %cst_98 : f32 to vector<8x8xf32>
    %222 = arith.mulf %221, %4 : vector<8x8xf32>
    %223 = arith.subf %222, %220 : vector<8x8xf32>
    %cst_99 = arith.constant 1.500000e+01 : f32
    %224 = vector.broadcast %cst_99 : f32 to vector<8x8xf32>
    %225 = arith.mulf %224, %4 : vector<8x8xf32>
    %cst_100 = arith.constant dense<0.000000e+00> : vector<8x8xf32>
    %226 = tpu.matmul %220, %223, %cst_100 {dimension_numbers = #tpu.dot_dimension_numbers<[1], [0], [0], [1], [0, 0, 1, 1], [], []>} : vector<8x8xf32>, vector<8x8xf32>, vector<8x8xf32> -> vector<8x8xf32>
    %227 = arith.subf %225, %226 : vector<8x8xf32>
    %cst_101 = arith.constant 1.300000e+01 : f32
    %228 = vector.broadcast %cst_101 : f32 to vector<8x8xf32>
    %229 = arith.mulf %228, %4 : vector<8x8xf32>
    %cst_102 = arith.constant dense<0.000000e+00> : vector<8x8xf32>
    %230 = tpu.matmul %220, %227, %cst_102 {dimension_numbers = #tpu.dot_dimension_numbers<[1], [0], [0], [1], [0, 0, 1, 1], [], []>} : vector<8x8xf32>, vector<8x8xf32>, vector<8x8xf32> -> vector<8x8xf32>
    %231 = arith.subf %229, %230 : vector<8x8xf32>
    %cst_103 = arith.constant dense<0.000000e+00> : vector<8x8xf32>
    %232 = tpu.matmul %219, %231, %cst_103 {dimension_numbers = #tpu.dot_dimension_numbers<[1], [0], [0], [1], [0, 0, 1, 1], [], []>} : vector<8x8xf32>, vector<8x8xf32>, vector<8x8xf32> -> vector<8x8xf32>
    %cst_104 = arith.constant 2.500000e-01 : f32
    %233 = vector.broadcast %cst_104 : f32 to vector<8x8xf32>
    %234 = arith.mulf %233, %232 : vector<8x8xf32>
    %cst_105 = arith.constant dense<0.000000e+00> : vector<8x8xf32>
    %235 = tpu.matmul %195, %234, %cst_105 {dimension_numbers = #tpu.dot_dimension_numbers<[1], [0], [0], [1], [0, 0, 1, 1], [], []>} : vector<8x8xf32>, vector<8x8xf32>, vector<8x8xf32> -> vector<8x8xf32>
    %cst_106 = arith.constant 7.000000e+00 : f32
    %236 = vector.broadcast %cst_106 : f32 to vector<8x8xf32>
    %237 = arith.mulf %236, %4 : vector<8x8xf32>
    %238 = arith.subf %237, %235 : vector<8x8xf32>
    %cst_107 = arith.constant 1.500000e+01 : f32
    %239 = vector.broadcast %cst_107 : f32 to vector<8x8xf32>
    %240 = arith.mulf %239, %4 : vector<8x8xf32>
    %cst_108 = arith.constant dense<0.000000e+00> : vector<8x8xf32>
    %241 = tpu.matmul %235, %238, %cst_108 {dimension_numbers = #tpu.dot_dimension_numbers<[1], [0], [0], [1], [0, 0, 1, 1], [], []>} : vector<8x8xf32>, vector<8x8xf32>, vector<8x8xf32> -> vector<8x8xf32>
    %242 = arith.subf %240, %241 : vector<8x8xf32>
    %cst_109 = arith.constant 1.300000e+01 : f32
    %243 = vector.broadcast %cst_109 : f32 to vector<8x8xf32>
    %244 = arith.mulf %243, %4 : vector<8x8xf32>
    %cst_110 = arith.constant dense<0.000000e+00> : vector<8x8xf32>
    %245 = tpu.matmul %235, %242, %cst_110 {dimension_numbers = #tpu.dot_dimension_numbers<[1], [0], [0], [1], [0, 0, 1, 1], [], []>} : vector<8x8xf32>, vector<8x8xf32>, vector<8x8xf32> -> vector<8x8xf32>
    %246 = arith.subf %244, %245 : vector<8x8xf32>
    %cst_111 = arith.constant dense<0.000000e+00> : vector<8x8xf32>
    %247 = tpu.matmul %234, %246, %cst_111 {dimension_numbers = #tpu.dot_dimension_numbers<[1], [0], [0], [1], [0, 0, 1, 1], [], []>} : vector<8x8xf32>, vector<8x8xf32>, vector<8x8xf32> -> vector<8x8xf32>
    %cst_112 = arith.constant 2.500000e-01 : f32
    %248 = vector.broadcast %cst_112 : f32 to vector<8x8xf32>
    %249 = arith.mulf %248, %247 : vector<8x8xf32>
    %cst_113 = arith.constant dense<0.000000e+00> : vector<8x8xf32>
    %250 = tpu.matmul %195, %249, %cst_113 {dimension_numbers = #tpu.dot_dimension_numbers<[1], [0], [0], [1], [0, 0, 1, 1], [], []>} : vector<8x8xf32>, vector<8x8xf32>, vector<8x8xf32> -> vector<8x8xf32>
    %cst_114 = arith.constant 7.000000e+00 : f32
    %251 = vector.broadcast %cst_114 : f32 to vector<8x8xf32>
    %252 = arith.mulf %251, %4 : vector<8x8xf32>
    %253 = arith.subf %252, %250 : vector<8x8xf32>
    %cst_115 = arith.constant 1.500000e+01 : f32
    %254 = vector.broadcast %cst_115 : f32 to vector<8x8xf32>
    %255 = arith.mulf %254, %4 : vector<8x8xf32>
    %cst_116 = arith.constant dense<0.000000e+00> : vector<8x8xf32>
    %256 = tpu.matmul %250, %253, %cst_116 {dimension_numbers = #tpu.dot_dimension_numbers<[1], [0], [0], [1], [0, 0, 1, 1], [], []>} : vector<8x8xf32>, vector<8x8xf32>, vector<8x8xf32> -> vector<8x8xf32>
    %257 = arith.subf %255, %256 : vector<8x8xf32>
    %cst_117 = arith.constant 1.300000e+01 : f32
    %258 = vector.broadcast %cst_117 : f32 to vector<8x8xf32>
    %259 = arith.mulf %258, %4 : vector<8x8xf32>
    %cst_118 = arith.constant dense<0.000000e+00> : vector<8x8xf32>
    %260 = tpu.matmul %250, %257, %cst_118 {dimension_numbers = #tpu.dot_dimension_numbers<[1], [0], [0], [1], [0, 0, 1, 1], [], []>} : vector<8x8xf32>, vector<8x8xf32>, vector<8x8xf32> -> vector<8x8xf32>
    %261 = arith.subf %259, %260 : vector<8x8xf32>
    %cst_119 = arith.constant dense<0.000000e+00> : vector<8x8xf32>
    %262 = tpu.matmul %249, %261, %cst_119 {dimension_numbers = #tpu.dot_dimension_numbers<[1], [0], [0], [1], [0, 0, 1, 1], [], []>} : vector<8x8xf32>, vector<8x8xf32>, vector<8x8xf32> -> vector<8x8xf32>
    %cst_120 = arith.constant 2.500000e-01 : f32
    %263 = vector.broadcast %cst_120 : f32 to vector<8x8xf32>
    %264 = arith.mulf %263, %262 : vector<8x8xf32>
    %cst_121 = arith.constant dense<0.000000e+00> : vector<8x8xf32>
    %265 = tpu.matmul %195, %264, %cst_121 {dimension_numbers = #tpu.dot_dimension_numbers<[1], [0], [0], [1], [0, 0, 1, 1], [], []>} : vector<8x8xf32>, vector<8x8xf32>, vector<8x8xf32> -> vector<8x8xf32>
    %cst_122 = arith.constant 7.000000e+00 : f32
    %266 = vector.broadcast %cst_122 : f32 to vector<8x8xf32>
    %267 = arith.mulf %266, %4 : vector<8x8xf32>
    %268 = arith.subf %267, %265 : vector<8x8xf32>
    %cst_123 = arith.constant 1.500000e+01 : f32
    %269 = vector.broadcast %cst_123 : f32 to vector<8x8xf32>
    %270 = arith.mulf %269, %4 : vector<8x8xf32>
    %cst_124 = arith.constant dense<0.000000e+00> : vector<8x8xf32>
    %271 = tpu.matmul %265, %268, %cst_124 {dimension_numbers = #tpu.dot_dimension_numbers<[1], [0], [0], [1], [0, 0, 1, 1], [], []>} : vector<8x8xf32>, vector<8x8xf32>, vector<8x8xf32> -> vector<8x8xf32>
    %272 = arith.subf %270, %271 : vector<8x8xf32>
    %cst_125 = arith.constant 1.300000e+01 : f32
    %273 = vector.broadcast %cst_125 : f32 to vector<8x8xf32>
    %274 = arith.mulf %273, %4 : vector<8x8xf32>
    %cst_126 = arith.constant dense<0.000000e+00> : vector<8x8xf32>
    %275 = tpu.matmul %265, %272, %cst_126 {dimension_numbers = #tpu.dot_dimension_numbers<[1], [0], [0], [1], [0, 0, 1, 1], [], []>} : vector<8x8xf32>, vector<8x8xf32>, vector<8x8xf32> -> vector<8x8xf32>
    %276 = arith.subf %274, %275 : vector<8x8xf32>
    %cst_127 = arith.constant dense<0.000000e+00> : vector<8x8xf32>
    %277 = tpu.matmul %264, %276, %cst_127 {dimension_numbers = #tpu.dot_dimension_numbers<[1], [0], [0], [1], [0, 0, 1, 1], [], []>} : vector<8x8xf32>, vector<8x8xf32>, vector<8x8xf32> -> vector<8x8xf32>
    %cst_128 = arith.constant 2.500000e-01 : f32
    %278 = vector.broadcast %cst_128 : f32 to vector<8x8xf32>
    %279 = arith.mulf %278, %277 : vector<8x8xf32>
    %cst_129 = arith.constant dense<0.000000e+00> : vector<8x8xf32>
    %280 = tpu.matmul %195, %279, %cst_129 {dimension_numbers = #tpu.dot_dimension_numbers<[1], [0], [0], [1], [0, 0, 1, 1], [], []>} : vector<8x8xf32>, vector<8x8xf32>, vector<8x8xf32> -> vector<8x8xf32>
    %cst_130 = arith.constant 7.000000e+00 : f32
    %281 = vector.broadcast %cst_130 : f32 to vector<8x8xf32>
    %282 = arith.mulf %281, %4 : vector<8x8xf32>
    %283 = arith.subf %282, %280 : vector<8x8xf32>
    %cst_131 = arith.constant 1.500000e+01 : f32
    %284 = vector.broadcast %cst_131 : f32 to vector<8x8xf32>
    %285 = arith.mulf %284, %4 : vector<8x8xf32>
    %cst_132 = arith.constant dense<0.000000e+00> : vector<8x8xf32>
    %286 = tpu.matmul %280, %283, %cst_132 {dimension_numbers = #tpu.dot_dimension_numbers<[1], [0], [0], [1], [0, 0, 1, 1], [], []>} : vector<8x8xf32>, vector<8x8xf32>, vector<8x8xf32> -> vector<8x8xf32>
    %287 = arith.subf %285, %286 : vector<8x8xf32>
    %cst_133 = arith.constant 1.300000e+01 : f32
    %288 = vector.broadcast %cst_133 : f32 to vector<8x8xf32>
    %289 = arith.mulf %288, %4 : vector<8x8xf32>
    %cst_134 = arith.constant dense<0.000000e+00> : vector<8x8xf32>
    %290 = tpu.matmul %280, %287, %cst_134 {dimension_numbers = #tpu.dot_dimension_numbers<[1], [0], [0], [1], [0, 0, 1, 1], [], []>} : vector<8x8xf32>, vector<8x8xf32>, vector<8x8xf32> -> vector<8x8xf32>
    %291 = arith.subf %289, %290 : vector<8x8xf32>
    %cst_135 = arith.constant dense<0.000000e+00> : vector<8x8xf32>
    %292 = tpu.matmul %279, %291, %cst_135 {dimension_numbers = #tpu.dot_dimension_numbers<[1], [0], [0], [1], [0, 0, 1, 1], [], []>} : vector<8x8xf32>, vector<8x8xf32>, vector<8x8xf32> -> vector<8x8xf32>
    %cst_136 = arith.constant 2.500000e-01 : f32
    %293 = vector.broadcast %cst_136 : f32 to vector<8x8xf32>
    %294 = arith.mulf %293, %292 : vector<8x8xf32>
    %cst_137 = arith.constant dense<0.000000e+00> : vector<8x8xf32>
    %295 = tpu.matmul %195, %294, %cst_137 {dimension_numbers = #tpu.dot_dimension_numbers<[1], [0], [0], [1], [0, 0, 1, 1], [], []>} : vector<8x8xf32>, vector<8x8xf32>, vector<8x8xf32> -> vector<8x8xf32>
    %cst_138 = arith.constant 7.000000e+00 : f32
    %296 = vector.broadcast %cst_138 : f32 to vector<8x8xf32>
    %297 = arith.mulf %296, %4 : vector<8x8xf32>
    %298 = arith.subf %297, %295 : vector<8x8xf32>
    %cst_139 = arith.constant 1.500000e+01 : f32
    %299 = vector.broadcast %cst_139 : f32 to vector<8x8xf32>
    %300 = arith.mulf %299, %4 : vector<8x8xf32>
    %cst_140 = arith.constant dense<0.000000e+00> : vector<8x8xf32>
    %301 = tpu.matmul %295, %298, %cst_140 {dimension_numbers = #tpu.dot_dimension_numbers<[1], [0], [0], [1], [0, 0, 1, 1], [], []>} : vector<8x8xf32>, vector<8x8xf32>, vector<8x8xf32> -> vector<8x8xf32>
    %302 = arith.subf %300, %301 : vector<8x8xf32>
    %cst_141 = arith.constant 1.300000e+01 : f32
    %303 = vector.broadcast %cst_141 : f32 to vector<8x8xf32>
    %304 = arith.mulf %303, %4 : vector<8x8xf32>
    %cst_142 = arith.constant dense<0.000000e+00> : vector<8x8xf32>
    %305 = tpu.matmul %295, %302, %cst_142 {dimension_numbers = #tpu.dot_dimension_numbers<[1], [0], [0], [1], [0, 0, 1, 1], [], []>} : vector<8x8xf32>, vector<8x8xf32>, vector<8x8xf32> -> vector<8x8xf32>
    %306 = arith.subf %304, %305 : vector<8x8xf32>
    %cst_143 = arith.constant dense<0.000000e+00> : vector<8x8xf32>
    %307 = tpu.matmul %294, %306, %cst_143 {dimension_numbers = #tpu.dot_dimension_numbers<[1], [0], [0], [1], [0, 0, 1, 1], [], []>} : vector<8x8xf32>, vector<8x8xf32>, vector<8x8xf32> -> vector<8x8xf32>
    %cst_144 = arith.constant 2.500000e-01 : f32
    %308 = vector.broadcast %cst_144 : f32 to vector<8x8xf32>
    %309 = arith.mulf %308, %307 : vector<8x8xf32>
    %cst_145 = arith.constant dense<0.000000e+00> : vector<16x8xf32>
    %310 = tpu.matmul %186, %309, %cst_145 {dimension_numbers = #tpu.dot_dimension_numbers<[1], [0], [0], [1], [0, 0, 1, 1], [], []>} : vector<16x8xf32>, vector<8x8xf32>, vector<16x8xf32> -> vector<16x8xf32>
    %cst_146 = arith.constant dense<0.000000e+00> : vector<8x16xf32>
    %311 = tpu.matmul %204, %169, %cst_146 {dimension_numbers = #tpu.dot_dimension_numbers<[1], [0], [0], [1], [0, 0, 1, 1], [], []>} : vector<8x16xf32>, vector<16x16xf32>, vector<8x16xf32> -> vector<8x16xf32>
    %cst_147 = arith.constant dense<0.000000e+00> : vector<16x16xf32>
    %312 = tpu.matmul %310, %311, %cst_147 {dimension_numbers = #tpu.dot_dimension_numbers<[1], [0], [0], [1], [0, 0, 1, 1], [], []>} : vector<16x8xf32>, vector<8x16xf32>, vector<16x16xf32> -> vector<16x16xf32>
    %c0_148 = arith.constant 0 : index
    %c0_149 = arith.constant 0 : index
    %c16_150 = arith.constant 16 : index
    %313 = vector.load %arg2[%c0_148, %c0_149, %c16_150] : memref<1x16x32xf32, #tpu.memory_space<vmem>>, vector<1x16x16xf32>
    %314 = vector.shape_cast %313 : vector<1x16x16xf32> to vector<16x16xf32>
    %315 = vector.shape_cast %312 : vector<16x16xf32> to vector<1x16x16xf32>
    tpu.vector_store %arg2[%c0_148, %c0_149, %c16_150], %315 {strides = array<i32>} : memref<1x16x32xf32, #tpu.memory_space<vmem>>, vector<1x16x16xf32>,
    return
  }
  func.func @transform_0(%arg0: i32) -> (i32, i32, i32) {
    %c0_i32 = arith.constant 0 : i32
    %c0_i32_0 = arith.constant 0 : i32
    %c0_i32_1 = arith.constant 0 : i32
    return %arg0, %c0_i32, %c0_i32_0 : i32, i32, i32
  }
  func.func @transform_1(%arg0: i32) -> (i32, i32, i32) {
    %c0_i32 = arith.constant 0 : i32
    %c0_i32_0 = arith.constant 0 : i32
    %c0_i32_1 = arith.constant 0 : i32
    return %arg0, %c0_i32, %c0_i32_0 : i32, i32, i32
  }
}

module attributes {stable_mosaic.version = 11 : i64} {
  func.func @_linear_bias_kernel(%arg0: i32, %arg1: memref<24x32xf32, #tpu.memory_space<vmem>>, %arg2: memref<32x32xf32, #tpu.memory_space<vmem>>, %arg3: memref<1x32xf32, #tpu.memory_space<vmem>>, %arg4: memref<24x32xf32, #tpu.memory_space<vmem>>) attributes {dimension_semantics = [#tpu.dimension_semantics<parallel>], iteration_bounds = array<i64: 1>, scalar_prefetch = 0 : i64, scratch_operands = 0 : i64, tpu.core_type = #tpu.core_type<tc>, window_params = [{transform_indices = @transform_0, window_bounds = array<i64: 24, 32>}, {pipeline_mode = #tpu.pipeline_mode<synchronous>, transform_indices = @transform_1, window_bounds = array<i64: 32, 32>}, {pipeline_mode = #tpu.pipeline_mode<synchronous>, transform_indices = @transform_2, window_bounds = array<i64: 1, 32>}, {transform_indices = @transform_3, window_bounds = array<i64: 24, 32>}]} {
    %c0 = arith.constant 0 : index
    %c0_0 = arith.constant 0 : index
    %0 = vector.load %arg1[%c0, %c0_0] : memref<24x32xf32, #tpu.memory_space<vmem>>, vector<24x32xf32>
    %c0_1 = arith.constant 0 : index
    %c0_2 = arith.constant 0 : index
    %1 = vector.load %arg2[%c0_1, %c0_2] : memref<32x32xf32, #tpu.memory_space<vmem>>, vector<32x32xf32>
    %cst = arith.constant dense<0.000000e+00> : vector<24x32xf32>
    %2 = tpu.matmul %0, %1, %cst {dimension_numbers = #tpu.dot_dimension_numbers<[1], [0], [0], [1], [0, 0, 1, 1], [], []>} : vector<24x32xf32>, vector<32x32xf32>, vector<24x32xf32> -> vector<24x32xf32>
    %c0_3 = arith.constant 0 : index
    %c0_4 = arith.constant 0 : index
    %3 = vector.load %arg3[%c0_3, %c0_4] : memref<1x32xf32, #tpu.memory_space<vmem>>, vector<1x32xf32>
    %4 = vector.broadcast %3 : vector<1x32xf32> to vector<24x32xf32>
    %5 = arith.addf %2, %4 : vector<24x32xf32>
    %c0_5 = arith.constant 0 : index
    %c0_6 = arith.constant 0 : index
    %6 = vector.load %arg4[%c0_5, %c0_6] : memref<24x32xf32, #tpu.memory_space<vmem>>, vector<24x32xf32>
    tpu.vector_store %arg4[%c0_5, %c0_6], %5 {strides = array<i32>} : memref<24x32xf32, #tpu.memory_space<vmem>>, vector<24x32xf32>,
    return
  }
  func.func @transform_0(%arg0: i32) -> (i32, i32) {
    %c0_i32 = arith.constant 0 : i32
    %c0_i32_0 = arith.constant 0 : i32
    return %arg0, %c0_i32 : i32, i32
  }
  func.func @transform_1(%arg0: i32) -> (i32, i32) {
    %c0_i32 = arith.constant 0 : i32
    %c0_i32_0 = arith.constant 0 : i32
    %c0_i32_1 = arith.constant 0 : i32
    return %c0_i32, %c0_i32_0 : i32, i32
  }
  func.func @transform_2(%arg0: i32) -> (i32, i32) {
    %c0_i32 = arith.constant 0 : i32
    %c0_i32_0 = arith.constant 0 : i32
    %c0_i32_1 = arith.constant 0 : i32
    return %c0_i32, %c0_i32_0 : i32, i32
  }
  func.func @transform_3(%arg0: i32) -> (i32, i32) {
    %c0_i32 = arith.constant 0 : i32
    %c0_i32_0 = arith.constant 0 : i32
    return %arg0, %c0_i32 : i32, i32
  }
}

</mosaic_0001>

<bundles_post_ra>
// kernel: attention_forward.3
= control target key start
LH: loop header
LB: loop body
LE: loop exit
PB: predicated region body
PF: predicated region fallthrough
CT: control target
= control target key end

     0   :  { %vm19_vm0 = vcmask 261120   ;;  %vm117_vm1 = vcmask 785408   ;;  %s211_s1 = inlined_call_operand.vmem [shape: f32[32,96], index: 1, kind: input, shape index: {}]   ;;  %s212_s0 = inlined_call_operand.vmem [shape: f32[32,32], index: 0, kind: input, shape index: {}]   ;;  %s213_s2 = inlined_call_operand.vmem [shape: f32[32,96], index: 2, kind: output, shape index: {}]  }
   0x1   :  { %v18_v0 = vld [vmem:[%s211_s1 + $0x18] sm:$0xff]  ;;  %v17_v1 = vld [vmem:[%s211_s1 + $0x10] sm:$0xff]  ;;  %v16_v2 = vld [vmem:[%s211_s1 + $0x8] sm:$0xff] }
   0x2   :  { %138 = vmatprep.subr.mxu0 %v18_v0  ;;  %152 = vmatprep.subr.mxu1 %v18_v0  ;;  %v15_v3 = vld [vmem:[%s211_s1] sm:$0xff]  ;;  %v13_v5 = vld [vmem:[%s212_s0 + $0x10] sm:$0xff]  ;;  %v12_v6 = vld [vmem:[%s212_s0 + $0x8] sm:$0xff] }
   0x3   :  { %139 = vmatpush3.msra.mxu0 %v18_v0  ;;  %156 = vmatpush3.msra.mxu1 %v18_v0  ;;  %v11_v4 = vld [vmem:[%s212_s0] sm:$0xff]  ;;  %v14_v7 = vld [vmem:[%s212_s0 + $0x18] sm:$0xff] }
   0x4   :  { %140 = vmatprep.subr.mxu0 %v17_v1  ;;  %153 = vmatprep.subr.mxu1 %v17_v1 }
   0x5   :  { %141 = vmatpush3.msra.mxu0 %v17_v1  ;;  %157 = vmatpush3.msra.mxu1 %v17_v1 }
   0x6   :  { %142 = vmatprep.subr.mxu0 %v16_v2  ;;  %154 = vmatprep.subr.mxu1 %v16_v2 }
   0x7   :  { %143 = vmatpush3.msra.mxu0 %v16_v2  ;;  %158 = vmatpush3.msra.mxu1 %v16_v2 }
   0x8   :  { %144 = vmatprep.subr.mxu0 %v15_v3  ;;  %155 = vmatprep.subr.mxu1 %v15_v3 }
   0x9   :  { %145 = vmatpush3.msra.mxu0 %v15_v3  ;;  %159 = vmatpush3.msra.mxu1 %v15_v3 }
   0xa   :  { %146 = vmatprep.mubr.msk.f32.mxu0 %vm19_vm0, %v11_v4  ;;  %149 = vmatprep.mubr.msk.f32.mxu1 %vm19_vm0, %v13_v5 }
   0xb   :  { %147 = vmatmul.mubr.msk.f32.vlgmr.msra.gmra.mxu0 %vm19_vm0, %v12_v6  ;;  %150 = vmatmul.mubr.msk.f32.vlgmr.msra.gmra.mxu1 %vm19_vm0, %v14_v7 }
  0xcb   :  { %v148_v8 = vpop.f32.mrf.mxu0  ;;  %v151_v9 = vpop.f32.mrf.mxu1 }
  0xcc   :  { %119 = vst.msk [vmem:[%s213_s2 + $0x8] sm:$0xff] %vm117_vm1, %v148_v8  ;;  %121 = vst.msk [vmem:[%s213_s2 + $0x18] sm:$0xff] %vm117_vm1, %v151_v9 }
  0xcd   :  { %v98_v10 = vpop.f32.mrf.mxu0  ;;  %v108_v11 = vpop.f32.mrf.mxu1 }
  0xce   :  { %118 = vst.msk [vmem:[%s213_s2] sm:$0xff] %vm117_vm1, %v98_v10  ;;  %120 = vst.msk [vmem:[%s213_s2 + $0x10] sm:$0xff] %vm117_vm1, %v108_v11 }

// kernel: attention_forward.5
= control target key start
LH: loop header
LB: loop body
LE: loop exit
PB: predicated region body
PF: predicated region fallthrough
CT: control target
= control target key end

     0   :  { %v163_v0 = vmov 0.0   ;;  %vm28_vm0 = vcmask 261120   ;;  %vm164_vm1 = vmmov 0   ;;  %s224_s1 = inlined_call_operand.vmem [shape: f32[32,32], index: 1, kind: input, shape index: {}]   ;;  %s225_s0 = inlined_call_operand.vmem [shape: f32[24,32], index: 0, kind: input, shape index: {}]   ;;  %s226_s2 = inlined_call_operand.vmem [shape: f32[1,32], index: 2, kind: input, shape index: {}]   ;;  %s227_s3 = inlined_call_operand.vmem [shape: f32[24,32], index: 3, kind: output, shape index: {}]  }
   0x1   :  { %153 = vmatprep.subr.mxu1 %v163_v0  ;;  %v20_v1 = vld [vmem:[%s224_s1 + $0x18] sm:$0xff]  ;;  %136 = vmatprep.subr.mxu0 %v163_v0  ;;  %v19_v2 = vld [vmem:[%s224_s1 + $0x10] sm:$0xff]  ;;  %v18_v3 = vld [vmem:[%s224_s1 + $0x8] sm:$0xff] }
   0x2   :  { %157 = vmatpush3.msra.mxu1 %v20_v1  ;;  %137 = vmatpush3.msra.mxu0 %v20_v1  ;;  %v17_v4 = vld [vmem:[%s224_s1] sm:$0xff]  ;;  %v15_v5 = vld [vmem:[%s225_s0 + $0x8] sm:$0xff]  ;;  %v16_v7 = vld [vmem:[%s225_s0 + $0x10] sm:$0xff] }
   0x3   :  { %154 = vmatprep.subr.mxu1 %v163_v0  ;;  %138 = vmatprep.subr.mxu0 %v163_v0  ;;  %v14_v6 = vld [vmem:[%s225_s0] sm:$0xff] }
   0x4   :  { %158 = vmatpush3.msra.mxu1 %v19_v2  ;;  %139 = vmatpush3.msra.mxu0 %v19_v2  ;;  %v125_v8 = vld [vmem:[%s226_s2] ss:$0 sm:$0xff] }
   0x5   :  { %155 = vmatprep.subr.mxu1 %v163_v0  ;;  %140 = vmatprep.subr.mxu0 %v163_v0 }
   0x6   :  { %159 = vmatpush3.msra.mxu1 %v18_v3  ;;  %141 = vmatpush3.msra.mxu0 %v18_v3 }
   0x7   :  { %156 = vmatprep.subr.mxu1 %v163_v0  ;;  %147 = vmatprep.mubr.msk.f32.mxu1 %vm164_vm1, %v163_v0 }
   0x8   :  { %160 = vmatpush3.msra.mxu1 %v17_v4  ;;  %142 = vmatprep.subr.mxu0 %v163_v0 }
   0x9   :  { %148 = vmatmul.mubr.msk.f32.vlgmr.msra.gmra.mxu1 %vm28_vm0, %v15_v5  ;;  %143 = vmatpush3.msra.mxu0 %v17_v4 }
   0xa   :  { %144 = vmatprep.mubr.msk.f32.mxu0 %vm164_vm1, %v163_v0  ;;  %150 = vmatprep.mubr.msk.f32.mxu1 %vm164_vm1, %v163_v0 }
   0xb   :  { %145 = vmatmul.mubr.msk.f32.vlgmr.msra.gmra.mxu0 %vm28_vm0, %v14_v6 }
   0xd   :  { %151 = vmatmul.mubr.msk.f32.gmra.mxu1 %vm28_vm0, %v16_v7 }
  0xc9   :  { %v109_v9 = vpop.f32.mrf.mxu1 }
  0xca   :  { %v110_v10 = vadd.f32 %v125_v8, %v109_v9 }
  0xcb   :  { %v104_v11 = vpop.f32.mrf.mxu0  ;;  %v149_v12 = vpop.f32.mrf.mxu1 }
  0xcc   :  { %119 = vst.msk [vmem:[%s227_s3 + $0x8] sm:$0xff] %vm28_vm0, %v110_v10  ;;  %v105_v13 = vadd.f32 %v125_v8, %v104_v11 }
  0xcd   :  { %v146_v14 = vpop.f32.mrf.mxu0  ;;  %v114_v15 = vpop.f32.mrf.mxu1 }
  0xce   :  { %118 = vst.msk [vmem:[%s227_s3] sm:$0xff] %vm28_vm0, %v105_v13  ;;  %v115_v16 = vadd.f32 %v125_v8, %v114_v15 }
  0xcf   :  { %v152_v17 = vpop.f32.mrf.mxu1 }
  0xd0   :  { %120 = vst.msk [vmem:[%s227_s3 + $0x10] sm:$0xff] %vm28_vm0, %v115_v16 }

// kernel: attention_forward.4
= control target key start
LH: loop header
LB: loop body
LE: loop exit
PB: predicated region body
PF: predicated region fallthrough
CT: control target
= control target key end

     0   :  { %s5468_s6 = smov 0   ;;  %s5887_s0 = inlined_call_operand.vmem [shape: f32[2,16,96], index: 0, kind: input, shape index: {}]   ;;  %s5888_s1 = inlined_call_operand.vmem [shape: f32[2,16,32], index: 1, kind: output, shape index: {}]  }
   0x1 LB: > { %s4853_s7 = sadd.s32 4294967295, %s5448_s6   ;;  %p4857_p0 = scmp.ge.s32.totalorder %s5448_s6, 1  ;;  %s5448_s6 = sphi %s5468_s6, %s11_s6  }
   0x2   : > { %p87_p1 = scmp.lt.s32.totalorder %s5448_s6, 3 }
   0x4   : > { %p88_p2 = pnand %p4857_p0, %p87_p1 }
   0x5   : > { %p107_p3 = scmp.lt.s32.totalorder (!%p88_p2), %s4853_s7, 1  ;;  %s5452_s12 = smov (!%p88_p2), 96  }
   0x6   : > { %91 = sbr.rel (%p88_p2) target bundleno = 11716 (0x2dc4), region = 24  ;;  %s5453_s16 = smov (!%p88_p2), 64  }
   0x7   : > { %s5454_s17 = smov (!%p88_p2), 80   ;;  %s5455_s18 = smov (!%p88_p2), 112  }
   0x8   : > { %s5456_s25 = smov (!%p88_p2), 48   ;;  %s5457_s26 = smov (!%p88_p2), 16  }
   0xb   : > { %v5450_v0 = vmov 0.0   ;;  %vm5451_vm0 = vmmov 0   ;;  %s5890_s7 = smov (!%p107_p3, %s4853_s7), 1  ;;  %vm134_vm1 = vcmask 130048   ;;  %vm368_vm2 = vcmask 64512  }
   0xc   : > { %5077 = vmatprep.subr.mxu1 %v5450_v0  ;;  %5079 = vmatprep.mubr.msk.f32.mxu1 %vm5451_vm0, %v5450_v0  ;;  %s4940_s8 = sshll.u32 %s5890_s7, 4  ;;  %v117_v49 = vlaneseq  ;;  %vm4795_vm4 = vcmask 261248  }
   0xd   : > { %s5487_s11 = scalar_lea.vmem %s5887_s0, %s4940_s8  ;;  %s5706_s21 = scalar_lea.vmem %s5888_s1, %s4940_s8 }
   0xe   : > { %v124_v1 = vld [vmem:[%s5487_s11] ss:$2 sm:$0xff]  ;;  %v4863_v2 = vld [vmem:[%s5487_s11 + $0x1] ss:$2 sm:$0xff]  ;;  %v118_v50 = vshrl.u32 %v117_v49, 7  ;;  %v120_v51 = vand.u32 127, %v117_v49 }
   0xf   : > { %v127_v3 = vadd.f32 %v4863_v2, %v124_v1  ;;  %v5512_v26 = vld [vmem:[%s5487_s11 + $0x8] sm:$0xff]  ;;  %v5515_v27 = vld [vmem:[%s5487_s11] sm:$0xff] }
  0x10   : > { %5074 = vmatprep.mubr.msk.f32.mxu0 %vm134_vm1, %v5515_v27  ;;  %vm121_vm3 = vcmp.eq.s32.totalorder %v118_v50, %v120_v51 }
  0x11   : > { %v5491_v4 = vmul.f32 0.5, %v127_v3  ;;  %v4862_v52 = vsel %vm121_vm3, 1.0, %v5450_v0 }
  0x12   : > { %v5545_v53 = vmul.f32 7.0, %v4862_v52 }
  0x13   : > { %132 = vrot.lane.b32.xlu0 %v5491_v4, %s5452_s12 }
  0x85   : > { %v133_v5 = vpop.permute.xlu0 %132 }
  0x86   : > { %5072 = vmatprep.subr.msk.mxu0 %vm134_vm1, %v133_v5  ;;  %5078 = vmatpush3.xpose.msk.msra.mxu1 %vm134_vm1, %v133_v5 }
  0x87   : > { %5073 = vmatpush3.xpose.msk.msra.mxu0 %vm134_vm1, %v133_v5  ;;  %5089 = vmatprep.subr.mxu1 %v5450_v0 }
  0x88   : > { %5082 = vmatprep.subr.mxu0 %v5450_v0 }
  0x89   : > { %5080 = vmatmul.mubr.msk.f32.vlgmr.msra.gmra.mxu1 %vm134_vm1, %v5491_v4 }
  0x8a   : > { %5091 = vmatprep.mubr.msk.f32.mxu1 %vm5451_vm0, %v5450_v0  ;;  %5075 = vmatmul.mubr.msk.f32.vlgmr.msra.gmra.mxu0 %vm134_vm1, %v5512_v26 }
  0x8b   : > { %5086 = vmatprep.mubr.msk.f32.mxu0 %vm5451_vm0, %v5450_v0 }
 0x149   : > { %v286_v6 = vpop.f32.mrf.mxu1 }
 0x14a   : > { %v391_v7 = vsel %vm368_vm2, %v286_v6, -inf  ;;  %v5076_v42 = vpop.f32.mrf.mxu0 }
 0x14b   : > { %392 = vmax.xlane.f32.xlu0 %v391_v7  ;;  %v5081_v8 = vpop.f32.mrf.mxu1  ;;  %v372_v43 = vsel %vm368_vm2, %v5076_v42, -inf }
 0x14c   : > { %v209_v44 = vpop.f32.mrf.mxu0 }
 0x14d   : > { %v369_v45 = vsel %vm368_vm2, %v209_v44, -inf }
 0x161   : > { %292 = vrot.lane.b32.xlu0 %v5512_v26, %s5452_s12 }
 0x165   : > { %290 = vrot.lane.b32.xlu0 %v5515_v27, %s5452_s12 }
 0x184   : > { %370 = vmax.xlane.f32.xlu0 %v369_v45 }
 0x1d4   : > { %v393_v9 = vpop.xlane.xlu0 %392 }
 0x1d5   : > { %v394_v10 = vsub.f32 %v286_v6, %v393_v9 }
 0x1d7   : > { %v395_v11 = vmul.f32 1.442695, %v394_v10  ;;  %v5564_v10 = vmul.f32 15.0, %v4862_v52 }
 0x1d8   : > { %v293_v30 = vpop.permute.xlu0 %292 }
 0x1d9   : > { %5404 = vpow2.f32 %v395_v11  ;;  %5083 = vmatpush3.xpose.msk.msra.mxu0 %vm134_vm1, %v293_v30 }
 0x1da   : > { %5084 = vmatprep.subr.mxu0 %v5450_v0 }
 0x1dc   : > { %v291_v33 = vpop.permute.xlu0 %290 }
 0x1dd   : > { %5085 = vmatpush3.xpose.msk.msra.mxu0 %vm134_vm1, %v291_v33 }
 0x1de   : > { %5099 = vmatprep.subr.mxu0 %v5450_v0 }
 0x1e0   : > { %5087 = vmatmul.mubr.msk.f32.vlgmr.msra.gmra.mxu0 %vm134_vm1, %v5491_v4 }
 0x1e1   : > { %5101 = vmatprep.mubr.msk.f32.mxu0 %vm5451_vm0, %v5450_v0 }
 0x1e6   : > { %v5405_v12 = vpop.eup %5404 }
 0x1e7   : > { %v397_v13 = vsel %vm368_vm2, %v5405_v12, 0.0 }
 0x1e8   : > { %398 = vadd.xlane.f32.xlu1 %v397_v13 }
 0x20d   : > { %v371_v57 = vpop.xlane.xlu0 %370 }
 0x20e   : > { %v375_v59 = vsub.f32 %v209_v44, %v371_v57 }
 0x210   : > { %v377_v61 = vmul.f32 1.442695, %v375_v59 }
 0x271   : > { %v399_v14 = vpop.xlane.xlu1 %398 }
 0x272   : > { %5406 = vrcp.f32 %v399_v14  ;;  %v5571_v14 = vmul.f32 13.0, %v4862_v52 }
 0x27f   : > { %v5407_v15 = vpop.eup %5406 }
 0x280   : > { %v5506_v16 = vmul.f32 %v5407_v15, %v5405_v12 }
 0x282   : > { %v413_v17 = vand.u32 2147483647, %v5506_v16 }
 0x284   : > { %v414_v18 = vsel %vm368_vm2, %v413_v17, 0.0 }
 0x285   : > { %415 = vadd.xlane.f32.xlu1 %v414_v18  ;;  %v417_v19 = vrot.slane %v414_v18, 4 }
 0x287   : > { %v418_v20 = vadd.f32 %v417_v19, %v414_v18 }
 0x289   : > { %v419_v21 = vrot.slane %v418_v20, 2 }
 0x28b   : > { %v420_v22 = vadd.f32 %v419_v21, %v418_v20 }
 0x28d   : > { %v421_v23 = vrot.slane %v420_v22, 1 }
 0x28f   : > { %v422_v24 = vadd.f32 %v421_v23, %v420_v22 }
 0x291   : > { %v462_v25 = vsel %vm368_vm2, %v422_v24, -inf }
 0x292   : > { %463 = vmax.xlane.f32.xlu1 %v462_v25 }
 0x2a0   : > { %v364_v46 = vpop.f32.mrf.mxu0 }
 0x2a1   : > { %v402_v47 = vsel %vm134_vm1, %v364_v46, -inf }
 0x2a2   : > { %403 = vmax.xlane.f32.xlu0 %v402_v47  ;;  %v5088_v48 = vpop.f32.mrf.mxu0 }
 0x2c5   : > { %423 = vxpose.xlu1.b32.start.end [1/1] (short) (narrow) %v5506_v16, 8 }
 0x2ec   : > { %373 = vmax.xlane.f32.xlu1 %v372_v43 }
 0x30e   : > { %v416_v28 = vpop.xlane.xlu1 %415 }
 0x30f   : > { %v455_v29 = vrot.slane %v416_v28, 4 }
 0x311   : > { %v456_v31 = vmax.f32 %v416_v28, %v455_v29 }
 0x313   : > { %v457_v32 = vrot.slane %v456_v31, 2 }
 0x315   : > { %v458_v34 = vmax.f32 %v456_v31, %v457_v32 }
 0x317   : > { %v459_v35 = vrot.slane %v458_v34, 1 }
 0x319   : > { %v460_v36 = vmax.f32 %v458_v34, %v459_v35 }
 0x31b   : > { %5380 = vpush %v460_v36  ;;  %v464_v37 = vpop.xlane.xlu1 %463 }
 0x31c   : > { %5382 = vpush %v464_v37 }
 0x32b   : > { %v404_v63 = vpop.xlane.xlu0 %403 }
 0x32c   : > { %v405_v1 = vsub.f32 %v364_v46, %v404_v63 }
 0x32e   : > { %v406_v2 = vmul.f32 1.442695, %v405_v1 }
 0x341   : > { %v439_v39 = vpop.trf.xlu1 }
 0x34c   : > { %s5381_s13 = spop %5380 }
 0x34d   : > { %s5383_s14 = spop %5382 }
 0x34e   : > { %s466_s15 = smul.f32 %s5383_s14, %s5381_s13 }
 0x350   : > { %v467_v38 = vstv %s466_s15 }
 0x351   : > { %5408 = vrcp.f32 %v467_v38 }
 0x352   : > { %5410 = vpow2.f32 %v377_v61 }
 0x35e   : > { %v5409_v40 = vpop.eup %5408 }
 0x35f   : > { %v469_v41 = vmul.f32 %v5409_v40, %v439_v39  ;;  %v5552_v3 = vpop.eup %5410 }
 0x360   : > { %v381_v6 = vsel %vm368_vm2, %v5552_v3, 0.0 }
 0x361   : > { %5090 = vmatpush3.msra.mxu1 %v469_v41  ;;  %382 = vadd.xlane.f32.xlu0 %v381_v6 }
 0x362   : > { %5092 = vmatmul.mubr.msk.f32.vlgmr.msra.gmra.mxu1 %vm368_vm2, %v5506_v16  ;;  %5094 = vmatprep.subr.mxu1 %v5450_v0 }
 0x363   : > { %5096 = vmatprep.mubr.msk.f32.mxu1 %vm5451_vm0, %v5450_v0 }
 0x375   : > { %v374_v58 = vpop.xlane.xlu1 %373 }
 0x376   : > { %v376_v60 = vsub.f32 %v5076_v42, %v374_v58 }
 0x378   : > { %v379_v62 = vmul.f32 1.442695, %v376_v60 }
 0x37a   : > { %5412 = vpow2.f32 %v379_v62 }
 0x37b   : > { %5414 = vpow2.f32 %v406_v2 }
 0x387   : > { %v5554_v5 = vpop.eup %5412 }
 0x388   : > { %v384_v7 = vsel %vm368_vm2, %v5554_v5, 0.0  ;;  %v5560_v8 = vpop.eup %5414 }
 0x389   : > { %v408_v9 = vsel %vm134_vm1, %v5560_v8, 0.0  ;;  %385 = vadd.xlane.f32.xlu0 %v384_v7 }
 0x38a   : > { %409 = vadd.xlane.f32.xlu1 %v408_v9 }
 0x39b   : > { %2297 = vrot.lane.b32.xlu1 %v5515_v27, %s5453_s16 }
 0x39f   : > { %2299 = vrot.lane.b32.xlu0 %v5512_v26, %s5453_s16  ;;  %2467 = vrot.lane.b32.xlu1 %v5491_v4, %s5454_s17 }
 0x3a3   : > { %2550 = vrot.lane.b32.xlu0 %v5491_v4, %s5455_s18 }
 0x422   : > { %v539_v54 = vpop.f32.mrf.mxu1 }
 0x423   : > { %v544_v55 = vsub.f32 %v5545_v53, %v539_v54 }
 0x424   : > { %v5093_v56 = vpop.f32.mrf.mxu1 }
 0x425   : > { %5095 = vmatpush3.msra.mxu1 %v544_v55 }
 0x426   : > { %5097 = vmatmul.mubr.msk.f32.vlgmr.msra.gmra.mxu1 %vm368_vm2, %v539_v54  ;;  %5104 = vmatprep.subr.mxu1 %v5450_v0 }
 0x427   : > { %5106 = vmatprep.mubr.msk.f32.mxu1 %vm5451_vm0, %v5450_v0 }
 0x4e6   : > { %v615_v11 = vpop.f32.mrf.mxu1 }
 0x4e7   : > { %v619_v12 = vsub.f32 %v5564_v10, %v615_v11 }
 0x4e8   : > { %v5098_v13 = vpop.f32.mrf.mxu1 }
 0x4e9   : > { %5100 = vmatpush3.msra.mxu0 %v619_v12 }
 0x4ea   : > { %5102 = vmatmul.mubr.msk.f32.vlgmr.msra.gmra.mxu0 %vm368_vm2, %v539_v54  ;;  %5109 = vmatprep.subr.mxu0 %v5450_v0 }
 0x4eb   : > { %5111 = vmatprep.mubr.msk.f32.mxu0 %vm5451_vm0, %v5450_v0 }
 0x5aa   : > { %v687_v15 = vpop.f32.mrf.mxu0 }
 0x5ab   : > { %v691_v17 = vsub.f32 %v5571_v14, %v687_v15 }
 0x5ac   : > { %v5103_v18 = vpop.f32.mrf.mxu0 }
 0x5ad   : > { %5105 = vmatpush3.msra.mxu1 %v691_v17 }
 0x5ae   : > { %5107 = vmatmul.mubr.msk.f32.vlgmr.msra.gmra.mxu1 %vm368_vm2, %v469_v41  ;;  %5114 = vmatprep.subr.mxu1 %v5450_v0 }
 0x5af   : > { %5116 = vmatprep.mubr.msk.f32.mxu1 %vm5451_vm0, %v5450_v0 }
 0x66e   : > { %v761_v19 = vpop.f32.mrf.mxu1 }
 0x66f   : > { %v765_v20 = vmul.f32 0.25, %v761_v19 }
 0x670   : > { %v5108_v21 = vpop.f32.mrf.mxu1 }
 0x671   : > { %5110 = vmatpush3.msra.mxu0 %v765_v20 }
 0x672   : > { %5112 = vmatmul.mubr.msk.f32.vlgmr.msra.gmra.mxu0 %vm368_vm2, %v5506_v16  ;;  %5119 = vmatprep.subr.mxu0 %v5450_v0 }
 0x673   : > { %5121 = vmatprep.mubr.msk.f32.mxu0 %vm5451_vm0, %v5450_v0 }
 0x732   : > { %v832_v22 = vpop.f32.mrf.mxu0 }
 0x733   : > { %v836_v23 = vsub.f32 %v5545_v53, %v832_v22 }
 0x734   : > { %v5113_v24 = vpop.f32.mrf.mxu0 }
 0x735   : > { %5115 = vmatpush3.msra.mxu1 %v836_v23 }
 0x736   : > { %5117 = vmatmul.mubr.msk.f32.vlgmr.msra.gmra.mxu1 %vm368_vm2, %v832_v22  ;;  %5124 = vmatprep.subr.mxu1 %v5450_v0 }
 0x737   : > { %5126 = vmatprep.mubr.msk.f32.mxu1 %vm5451_vm0, %v5450_v0 }
 0x7f6   : > { %v906_v25 = vpop.f32.mrf.mxu1 }
 0x7f7   : > { %v910_v28 = vsub.f32 %v5564_v10, %v906_v25  ;;  %v410_v25 = vpop.xlane.xlu1 %409 }
 0x7f8   : > { %v5118_v29 = vpop.f32.mrf.mxu1 }
 0x7f9   : > { %5120 = vmatpush3.msra.mxu0 %v910_v28 }
 0x7fa   : > { %5122 = vmatmul.mubr.msk.f32.vlgmr.msra.gmra.mxu0 %vm368_vm2, %v832_v22  ;;  %5129 = vmatprep.subr.mxu0 %v5450_v0 }
 0x7fb   : > { %5131 = vmatprep.mubr.msk.f32.mxu0 %vm5451_vm0, %v5450_v0 }
 0x8ba   : > { %v977_v30 = vpop.f32.mrf.mxu0 }
 0x8bb   : > { %v981_v31 = vsub.f32 %v5571_v14, %v977_v30 }
 0x8bc   : > { %v5123_v32 = vpop.f32.mrf.mxu0 }
 0x8bd   : > { %5125 = vmatpush3.msra.mxu1 %v981_v31 }
 0x8be   : > { %5127 = vmatmul.mubr.msk.f32.vlgmr.msra.gmra.mxu1 %vm368_vm2, %v765_v20  ;;  %5134 = vmatprep.subr.mxu1 %v5450_v0 }
 0x8bf   : > { %5136 = vmatprep.mubr.msk.f32.mxu1 %vm5451_vm0, %v5450_v0 }
 0x97e   : > { %v1051_v33 = vpop.f32.mrf.mxu1 }
 0x97f   : > { %v1055_v34 = vmul.f32 0.25, %v1051_v33 }
 0x980   : > { %v5128_v35 = vpop.f32.mrf.mxu1 }
 0x981   : > { %5130 = vmatpush3.msra.mxu0 %v1055_v34 }
 0x982   : > { %5132 = vmatmul.mubr.msk.f32.vlgmr.msra.gmra.mxu0 %vm368_vm2, %v5506_v16  ;;  %5139 = vmatprep.subr.mxu0 %v5450_v0 }
 0x983   : > { %5141 = vmatprep.mubr.msk.f32.mxu0 %vm5451_vm0, %v5450_v0 }
 0xa42   : > { %v1122_v36 = vpop.f32.mrf.mxu0 }
 0xa43   : > { %v1126_v37 = vsub.f32 %v5545_v53, %v1122_v36 }
 0xa44   : > { %v5133_v38 = vpop.f32.mrf.mxu0 }
 0xa45   : > { %5135 = vmatpush3.msra.mxu1 %v1126_v37 }
 0xa46   : > { %5137 = vmatmul.mubr.msk.f32.vlgmr.msra.gmra.mxu1 %vm368_vm2, %v1122_v36  ;;  %5144 = vmatprep.subr.mxu1 %v5450_v0 }
 0xa47   : > { %5146 = vmatprep.mubr.msk.f32.mxu1 %vm5451_vm0, %v5450_v0 }
 0xb06   : > { %v1196_v39 = vpop.f32.mrf.mxu1 }
 0xb07   : > { %v1200_v40 = vsub.f32 %v5564_v10, %v1196_v39 }
 0xb08   : > { %v5138_v41 = vpop.f32.mrf.mxu1 }
 0xb09   : > { %5140 = vmatpush3.msra.mxu0 %v1200_v40 }
 0xb0a   : > { %5142 = vmatmul.mubr.msk.f32.vlgmr.msra.gmra.mxu0 %vm368_vm2, %v1122_v36  ;;  %5149 = vmatprep.subr.mxu0 %v5450_v0 }
 0xb0b   : > { %5151 = vmatprep.mubr.msk.f32.mxu0 %vm5451_vm0, %v5450_v0 }
 0xbca   : > { %v1267_v42 = vpop.f32.mrf.mxu0 }
 0xbcb   : > { %v1271_v43 = vsub.f32 %v5571_v14, %v1267_v42 }
 0xbcc   : > { %v5143_v44 = vpop.f32.mrf.mxu0 }
 0xbcd   : > { %5145 = vmatpush3.msra.mxu1 %v1271_v43 }
 0xbce   : > { %5147 = vmatmul.mubr.msk.f32.vlgmr.msra.gmra.mxu1 %vm368_vm2, %v1055_v34  ;;  %5154 = vmatprep.subr.mxu1 %v5450_v0  ;;  %v2298_v34 = vpop.permute.xlu1 %2297 }
 0xbcf   : > { %5156 = vmatprep.mubr.msk.f32.mxu1 %vm5451_vm0, %v5450_v0 }
 0xbd2   : > { %v2468_v41 = vpop.permute.xlu1 %2467 }
 0xc8e   : > { %v1341_v45 = vpop.f32.mrf.mxu1 }
 0xc8f   : > { %v1345_v46 = vmul.f32 0.25, %v1341_v45 }
 0xc90   : > { %v5148_v47 = vpop.f32.mrf.mxu1 }
 0xc91   : > { %5150 = vmatpush3.msra.mxu0 %v1345_v46 }
 0xc92   : > { %5152 = vmatmul.mubr.msk.f32.vlgmr.msra.gmra.mxu0 %vm368_vm2, %v5506_v16  ;;  %5159 = vmatprep.subr.mxu0 %v5450_v0 }
 0xc93   : > { %5161 = vmatprep.mubr.msk.f32.mxu0 %vm5451_vm0, %v5450_v0 }
 0xd52   : > { %v1412_v48 = vpop.f32.mrf.mxu0 }
 0xd53   : > { %v1416_v49 = vsub.f32 %v5545_v53, %v1412_v48 }
 0xd54   : > { %v5153_v50 = vpop.f32.mrf.mxu0 }
 0xd55   : > { %5155 = vmatpush3.msra.mxu1 %v1416_v49 }
 0xd56   : > { %5157 = vmatmul.mubr.msk.f32.vlgmr.msra.gmra.mxu1 %vm368_vm2, %v1412_v48  ;;  %5164 = vmatprep.subr.mxu1 %v5450_v0 }
 0xd57   : > { %5166 = vmatprep.mubr.msk.f32.mxu1 %vm5451_vm0, %v5450_v0 }
 0xe16   : > { %v1486_v51 = vpop.f32.mrf.mxu1 }
 0xe17   : > { %v1490_v52 = vsub.f32 %v5564_v10, %v1486_v51 }
 0xe18   : > { %v5158_v54 = vpop.f32.mrf.mxu1 }
 0xe19   : > { %5160 = vmatpush3.msra.mxu0 %v1490_v52 }
 0xe1a   : > { %5162 = vmatmul.mubr.msk.f32.vlgmr.msra.gmra.mxu0 %vm368_vm2, %v1412_v48  ;;  %5169 = vmatprep.subr.mxu0 %v5450_v0 }
 0xe1b   : > { %5171 = vmatprep.mubr.msk.f32.mxu0 %vm5451_vm0, %v5450_v0 }
 0xeda   : > { %v1557_v55 = vpop.f32.mrf.mxu0 }
 0xedb   : > { %v1561_v56 = vsub.f32 %v5571_v14, %v1557_v55 }
 0xedc   : > { %v5163_v57 = vpop.f32.mrf.mxu0 }
 0xedd   : > { %5165 = vmatpush3.msra.mxu1 %v1561_v56 }
 0xede   : > { %5167 = vmatmul.mubr.msk.f32.vlgmr.msra.gmra.mxu1 %vm368_vm2, %v1345_v46  ;;  %5174 = vmatprep.subr.mxu1 %v5450_v0 }
 0xedf   : > { %5176 = vmatprep.mubr.msk.f32.mxu1 %vm5451_vm0, %v5450_v0 }
 0xf9e   : > { %v1631_v58 = vpop.f32.mrf.mxu1 }
 0xf9f   : > { %v1635_v59 = vmul.f32 0.25, %v1631_v58 }
 0xfa0   : > { %v5168_v60 = vpop.f32.mrf.mxu1 }
 0xfa1   : > { %5170 = vmatpush3.msra.mxu0 %v1635_v59 }
 0xfa2   : > { %5172 = vmatmul.mubr.msk.f32.vlgmr.msra.gmra.mxu0 %vm368_vm2, %v5506_v16  ;;  %5179 = vmatprep.subr.mxu0 %v5450_v0 }
 0xfa3   : > { %5181 = vmatprep.mubr.msk.f32.mxu0 %vm5451_vm0, %v5450_v0 }
0x1062   : > { %v1702_v61 = vpop.f32.mrf.mxu0 }
0x1063   : > { %v1706_v62 = vsub.f32 %v5545_v53, %v1702_v61 }
0x1064   : > { %v5173_v63 = vpop.f32.mrf.mxu0 }
0x1065   : > { %5175 = vmatpush3.msra.mxu1 %v1706_v62 }
0x1066   : > { %5177 = vmatmul.mubr.msk.f32.vlgmr.msra.gmra.mxu1 %vm368_vm2, %v1702_v61  ;;  %5184 = vmatprep.subr.mxu1 %v5450_v0 }
0x1067   : > { %5186 = vmatprep.mubr.msk.f32.mxu1 %vm5451_vm0, %v5450_v0 }
0x1126   : > { %v1776_v1 = vpop.f32.mrf.mxu1 }
0x1127   : > { %v1780_v2 = vsub.f32 %v5564_v10, %v1776_v1 }
0x1128   : > { %v5178_v6 = vpop.f32.mrf.mxu1 }
0x1129   : > { %5180 = vmatpush3.msra.mxu0 %v1780_v2 }
0x112a   : > { %5182 = vmatmul.mubr.msk.f32.vlgmr.msra.gmra.mxu0 %vm368_vm2, %v1702_v61  ;;  %5189 = vmatprep.subr.mxu0 %v5450_v0 }
0x112b   : > { %5191 = vmatprep.mubr.msk.f32.mxu0 %vm5451_vm0, %v5450_v0 }
0x11ea   : > { %v1847_v7 = vpop.f32.mrf.mxu0 }
0x11eb   : > { %v1851_v9 = vsub.f32 %v5571_v14, %v1847_v7 }
0x11ec   : > { %v5183_v11 = vpop.f32.mrf.mxu0 }
0x11ed   : > { %5185 = vmatpush3.msra.mxu1 %v1851_v9 }
0x11ee   : > { %5187 = vmatmul.mubr.msk.f32.vlgmr.msra.gmra.mxu1 %vm368_vm2, %v1635_v59  ;;  %5194 = vmatprep.subr.mxu1 %v5450_v0 }
0x11ef   : > { %5196 = vmatprep.mubr.msk.f32.mxu1 %vm5451_vm0, %v5450_v0 }
0x12ae   : > { %v1921_v12 = vpop.f32.mrf.mxu1 }
0x12af   : > { %v1925_v13 = vmul.f32 0.25, %v1921_v12 }
0x12b0   : > { %v5188_v15 = vpop.f32.mrf.mxu1 }
0x12b1   : > { %5190 = vmatpush3.msra.mxu0 %v1925_v13 }
0x12b2   : > { %5192 = vmatmul.mubr.msk.f32.vlgmr.msra.gmra.mxu0 %vm368_vm2, %v5506_v16  ;;  %5199 = vmatprep.subr.mxu0 %v5450_v0  ;;  %v383_v16 = vpop.xlane.xlu0 %382 }
0x12b3   : > { %5201 = vmatprep.mubr.msk.f32.mxu0 %vm5451_vm0, %v5450_v0  ;;  %5416 = vrcp.f32 %v383_v16 }
0x12b4   : > { %5418 = vrcp.f32 %v410_v25 }
0x12b6   : > { %v386_v28 = vpop.xlane.xlu0 %385 }
0x12b7   : > { %5420 = vrcp.f32 %v386_v28 }
0x12ba   : > { %v2300_v32 = vpop.permute.xlu0 %2299 }
0x12c0   : > { %v5417_v20 = vpop.eup %5416 }
0x12c1   : > { %v388_v24 = vmul.f32 %v5417_v20, %v5552_v3  ;;  %v5419_v33 = vpop.eup %5418 }
0x12c2   : > { %v412_v3 = vmul.f32 %v5419_v33, %v5560_v8 }
0x12c4   : > { %v5421_v35 = vpop.eup %5420 }
0x12c5   : > { %v390_v39 = vmul.f32 %v5421_v35, %v5554_v5  ;;  %v2551_v5 = vpop.permute.xlu0 %2550 }
0x1372   : > { %v1992_v17 = vpop.f32.mrf.mxu0 }
0x1373   : > { %v1996_v18 = vsub.f32 %v5545_v53, %v1992_v17 }
0x1374   : > { %v5193_v19 = vpop.f32.mrf.mxu0 }
0x1375   : > { %5195 = vmatpush3.msra.mxu1 %v1996_v18 }
0x1376   : > { %5197 = vmatmul.mubr.msk.f32.vlgmr.msra.gmra.mxu1 %vm368_vm2, %v1992_v17  ;;  %5204 = vmatprep.subr.mxu1 %v5450_v0 }
0x1377   : > { %5206 = vmatprep.mubr.msk.f32.mxu1 %vm5451_vm0, %v5450_v0 }
0x1436   : > { %v2066_v21 = vpop.f32.mrf.mxu1 }
0x1437   : > { %v2070_v22 = vsub.f32 %v5564_v10, %v2066_v21 }
0x1438   : > { %v5198_v23 = vpop.f32.mrf.mxu1 }
0x1439   : > { %5200 = vmatpush3.msra.mxu0 %v2070_v22 }
0x143a   : > { %5202 = vmatmul.mubr.msk.f32.vlgmr.msra.gmra.mxu0 %vm368_vm2, %v1992_v17 }
0x143b   : > { %5211 = vmatprep.mubr.msk.f32.mxu0 %vm368_vm2, %v388_v24 }
0x14fa   : > { %v2137_v29 = vpop.f32.mrf.mxu0 }
0x14fb   : > { %v2141_v30 = vsub.f32 %v5571_v14, %v2137_v29 }
0x14fc   : > { %v5203_v31 = vpop.f32.mrf.mxu0 }
0x14fd   : > { %5205 = vmatpush3.msra.mxu1 %v2141_v30 }
0x14fe   : > { %5207 = vmatmul.mubr.msk.f32.vlgmr.msra.gmra.mxu1 %vm368_vm2, %v1925_v13  ;;  %5214 = vmatprep.subr.mxu1 %v5450_v0 }
0x14ff   : > { %5215 = vmatpush3.msra.mxu1 %v2300_v32  ;;  %5218 = vmatprep.mubr.msk.f32.mxu1 %vm5451_vm0, %v5450_v0 }
0x1500   : > { %5216 = vmatprep.subr.mxu1 %v5450_v0 }
0x1501   : > { %5217 = vmatpush3.msra.mxu1 %v2298_v34 }
0x1502   : > { %5219 = vmatmul.mubr.msk.f32.vlgmr.msra.gmra.mxu1 %vm134_vm1, %v412_v3  ;;  %5226 = vmatprep.subr.msk.mxu1 %vm134_vm1, %v2468_v41 }
0x1503   : > { %5227 = vmatpush3.xpose.msk.msra.mxu1 %vm134_vm1, %v2468_v41 }
0x1504   : > { %5236 = vmatprep.subr.mxu1 %v5450_v0 }
0x15be   : > { %v2211_v36 = vpop.f32.mrf.mxu1 }
0x15bf   : > { %v2215_v37 = vmul.f32 0.25, %v2211_v36 }
0x15c0   : > { %v5208_v38 = vpop.f32.mrf.mxu1 }
0x15c1   : > { %5209 = vmatprep.subr.mxu0 %v2215_v37 }
0x15c2   : > { %5210 = vmatpush3.msra.mxu0 %v2215_v37  ;;  %v2372_v8 = vpop.f32.mrf.mxu1 }
0x15c3   : > { %5212 = vmatmul.mubr.msk.f32.vlgmr.msra.gmra.mxu0 %vm368_vm2, %v390_v39  ;;  %5221 = vmatprep.subr.mxu0 %v2372_v8 }
0x15c4   : > { %v5220_v40 = vpop.f32.mrf.mxu1  ;;  %5222 = vmatpush3.msra.mxu0 %v2372_v8 }
0x15c5   : > { %5231 = vmatprep.subr.mxu0 %v5450_v0 }
0x1683   : > { %v5213_v4 = vpop.f32.mrf.mxu0 }
0x1685   : > { %v2288_v42 = vpop.f32.mrf.mxu0 }
0x1686   : > { %5223 = vmatprep.mubr.msk.f32.mxu0 %vm368_vm2, %v2288_v42 }
0x1687   : > { %5224 = vmatmul.mubr.msk.f32.vlgmr.msra.gmra.mxu0 %vm368_vm2, %v5213_v4 }
0x1688   : > { %5232 = vmatpush3.xpose.msk.msra.mxu0 %vm134_vm1, %v2468_v41  ;;  %5233 = vmatprep.mubr.msk.f32.mxu0 %vm5451_vm0, %v5450_v0 }
0x1689   : > { %5243 = vmatprep.subr.mxu0 %v5450_v0 }
0x168b   : > { %5234 = vmatmul.mubr.msk.f32.vlgmr.msra.gmra.mxu0 %vm134_vm1, %v2551_v5 }
0x168c   : > { %5245 = vmatprep.mubr.msk.f32.mxu0 %vm5451_vm0, %v5450_v0 }
0x1747   : > { %v5225_v43 = vpop.f32.mrf.mxu0 }
0x1748   : > { %2458 = vst.msk [vmem:[%s5706_s21 + $0x8] sm:$0xff] %vm134_vm1, %v5225_v43 }
0x1749   : > { %v2448_v44 = vpop.f32.mrf.mxu0 }
0x174a   : > { %2457 = vst.msk [vmem:[%s5706_s21] sm:$0xff] %vm134_vm1, %v2448_v44 }
0x174b   : > { %v2620_v45 = vpop.f32.mrf.mxu0 }
0x174c   : > { %v2724_v46 = vsel %vm368_vm2, %v2620_v45, -inf }
0x174d   : > { %2725 = vmax.xlane.f32.xlu1 %v2724_v46  ;;  %v5235_v47 = vpop.f32.mrf.mxu0 }
0x17d6   : > { %v2726_v48 = vpop.xlane.xlu1 %2725 }
0x17d7   : > { %v2727_v49 = vsub.f32 %v2620_v45, %v2726_v48 }
0x17d9   : > { %v2728_v50 = vmul.f32 1.442695, %v2727_v49 }
0x17db   : > { %5422 = vpow2.f32 %v2728_v50 }
0x17e8   : > { %v5423_v51 = vpop.eup %5422 }
0x17e9   : > { %v2730_v52 = vsel %vm368_vm2, %v5423_v51, 0.0 }
0x17ea   : > { %2731 = vadd.xlane.f32.xlu0 %v2730_v52 }
0x1873   : > { %v2732_v54 = vpop.xlane.xlu0 %2731 }
0x1874   : > { %5424 = vrcp.f32 %v2732_v54 }
0x1881   : > { %v5425_v55 = vpop.eup %5424 }
0x1882   : > { %v5714_v56 = vmul.f32 %v5425_v55, %v5423_v51 }
0x1884   : > { %v2746_v57 = vand.u32 2147483647, %v5714_v56 }
0x1886   : > { %v2747_v58 = vsel %vm368_vm2, %v2746_v57, 0.0 }
0x1887   : > { %2748 = vadd.xlane.f32.xlu0 %v2747_v58  ;;  %v2750_v59 = vrot.slane %v2747_v58, 4 }
0x1889   : > { %v2751_v60 = vadd.f32 %v2750_v59, %v2747_v58 }
0x188b   : > { %v2752_v61 = vrot.slane %v2751_v60, 2 }
0x188d   : > { %v2753_v62 = vadd.f32 %v2752_v61, %v2751_v60 }
0x188f   : > { %v2754_v63 = vrot.slane %v2753_v62, 1 }
0x1891   : > { %v2755_v1 = vadd.f32 %v2754_v63, %v2753_v62 }
0x1893   : > { %v2795_v2 = vsel %vm368_vm2, %v2755_v1, -inf }
0x1894   : > { %2796 = vmax.xlane.f32.xlu1 %v2795_v2 }
0x18a5   : > { %2463 = vrot.lane.b32.xlu1 %v5515_v27, %s5455_s18 }
0x18a9   : > { %2465 = vrot.lane.b32.xlu1 %v5512_v26, %s5455_s18 }
0x18ad   : > { %2626 = vrot.lane.b32.xlu1 %v5512_v26, %s5454_s17 }
0x18b1   : > { %2624 = vrot.lane.b32.xlu1 %v5515_v27, %s5454_s17 }
0x18b4   : > { %2756 = vxpose.xlu0.b32.start.end [1/1] (short) (narrow) %v5714_v56, 8 }
0x1910   : > { %v2749_v6 = vpop.xlane.xlu0 %2748 }
0x1911   : > { %v2788_v7 = vrot.slane %v2749_v6, 4 }
0x1913   : > { %v2789_v9 = vmax.f32 %v2749_v6, %v2788_v7 }
0x1915   : > { %v2790_v11 = vrot.slane %v2789_v9, 2 }
0x1917   : > { %v2791_v12 = vmax.f32 %v2789_v9, %v2790_v11 }
0x1919   : > { %v2792_v13 = vrot.slane %v2791_v12, 1 }
0x191b   : > { %v2793_v15 = vmax.f32 %v2791_v12, %v2792_v13 }
0x191d   : > { %5384 = vpush %v2793_v15  ;;  %v2797_v17 = vpop.xlane.xlu1 %2796 }
0x191e   : > { %5386 = vpush %v2797_v17 }
0x1921   : > { %v2464_v18 = vpop.permute.xlu1 %2463 }
0x1922   : > { %5228 = vmatprep.mubr.msk.f32.mxu1 %vm134_vm1, %v2464_v18 }
0x1925   : > { %v2466_v19 = vpop.permute.xlu1 %2465 }
0x1926   : > { %5229 = vmatmul.mubr.msk.f32.vlgmr.msra.gmra.mxu1 %vm134_vm1, %v2466_v19 }
0x1927   : > { %5240 = vmatprep.mubr.msk.f32.mxu1 %vm5451_vm0, %v5450_v0 }
0x1929   : > { %v2627_v26 = vpop.permute.xlu1 %2626 }
0x192a   : > { %5237 = vmatpush3.xpose.msk.msra.mxu1 %vm134_vm1, %v2627_v26 }
0x192b   : > { %5238 = vmatprep.subr.mxu1 %v5450_v0 }
0x192d   : > { %v2625_v27 = vpop.permute.xlu1 %2624 }
0x192e   : > { %5239 = vmatpush3.xpose.msk.msra.mxu1 %vm134_vm1, %v2625_v27 }
0x192f   : > { %5253 = vmatprep.subr.mxu1 %v5450_v0 }
0x1930   : > { %v2772_v20 = vpop.trf.xlu0 }
0x1931   : > { %5241 = vmatmul.mubr.msk.f32.vlgmr.msra.gmra.mxu1 %vm134_vm1, %v2551_v5 }
0x1932   : > { %5255 = vmatprep.mubr.msk.f32.mxu1 %vm5451_vm0, %v5450_v0 }
0x194e   : > { %s5385_s22 = spop %5384 }
0x194f   : > { %s5387_s23 = spop %5386 }
0x1950   : > { %s2799_s24 = smul.f32 %s5387_s23, %s5385_s22 }
0x1952   : > { %v2800_v16 = vstv %s2799_s24 }
0x1953   : > { %5426 = vrcp.f32 %v2800_v16 }
0x1960   : > { %v5427_v21 = vpop.eup %5426 }
0x1961   : > { %v2802_v22 = vmul.f32 %v5427_v21, %v2772_v20 }
0x1963   : > { %5244 = vmatpush3.msra.mxu0 %v2802_v22 }
0x1964   : > { %5246 = vmatmul.mubr.msk.f32.vlgmr.msra.gmra.mxu0 %vm368_vm2, %v5714_v56  ;;  %5248 = vmatprep.subr.mxu0 %v5450_v0 }
0x1965   : > { %5250 = vmatprep.mubr.msk.f32.mxu0 %vm5451_vm0, %v5450_v0 }
0x19e6   : > { %v5230_v23 = vpop.f32.mrf.mxu1 }
0x19e7   : > { %v2705_v24 = vsel %vm368_vm2, %v5230_v23, -inf }
0x19e8   : > { %v2541_v25 = vpop.f32.mrf.mxu1  ;;  %2706 = vmax.xlane.f32.xlu0 %v2705_v24 }
0x19e9   : > { %v2702_v28 = vsel %vm368_vm2, %v2541_v25, -inf }
0x19ea   : > { %2703 = vmax.xlane.f32.xlu1 %v2702_v28 }
0x19f1   : > { %v2698_v29 = vpop.f32.mrf.mxu1 }
0x19f2   : > { %v2735_v30 = vsel %vm134_vm1, %v2698_v29, -inf }
0x19f3   : > { %2736 = vmax.xlane.f32.xlu1 %v2735_v30  ;;  %v5242_v31 = vpop.f32.mrf.mxu1 }
0x1a24   : > { %v2872_v32 = vpop.f32.mrf.mxu0 }
0x1a25   : > { %v2876_v33 = vsub.f32 %v5545_v53, %v2872_v32 }
0x1a26   : > { %v5247_v34 = vpop.f32.mrf.mxu0 }
0x1a27   : > { %5249 = vmatpush3.msra.mxu0 %v2876_v33 }
0x1a28   : > { %5251 = vmatmul.mubr.msk.f32.vlgmr.msra.gmra.mxu0 %vm368_vm2, %v2872_v32  ;;  %5258 = vmatprep.subr.mxu0 %v5450_v0 }
0x1a29   : > { %5260 = vmatprep.mubr.msk.f32.mxu0 %vm5451_vm0, %v5450_v0 }
0x1a71   : > { %v2707_v3 = vpop.xlane.xlu0 %2706 }
0x1a72   : > { %v2709_v35 = vsub.f32 %v5230_v23, %v2707_v3 }
0x1a73   : > { %v2704_v36 = vpop.xlane.xlu1 %2703 }
0x1a74   : > { %v2708_v37 = vsub.f32 %v2541_v25, %v2704_v36  ;;  %v2712_v38 = vmul.f32 1.442695, %v2709_v35 }
0x1a76   : > { %v2710_v39 = vmul.f32 1.442695, %v2708_v37  ;;  %5428 = vpow2.f32 %v2712_v38 }
0x1a78   : > { %5430 = vpow2.f32 %v2710_v39 }
0x1a7c   : > { %v2737_v8 = vpop.xlane.xlu1 %2736 }
0x1a7d   : > { %v2738_v40 = vsub.f32 %v2698_v29, %v2737_v8 }
0x1a7f   : > { %v2739_v41 = vmul.f32 1.442695, %v2738_v40 }
0x1a81   : > { %5432 = vpow2.f32 %v2739_v41 }
0x1a83   : > { %v5752_v4 = vpop.eup %5428 }
0x1a84   : > { %v2717_v43 = vsel %vm368_vm2, %v5752_v4, 0.0 }
0x1a85   : > { %v5754_v42 = vpop.eup %5430 }
0x1a86   : > { %v2714_v5 = vsel %vm368_vm2, %v5754_v42, 0.0 }
0x1a87   : > { %2715 = vadd.xlane.f32.xlu1 %v2714_v5 }
0x1a8b   : > { %2718 = vadd.xlane.f32.xlu1 %v2717_v43 }
0x1a8e   : > { %v5760_v44 = vpop.eup %5432 }
0x1a8f   : > { %v2741_v45 = vsel %vm134_vm1, %v5760_v44, 0.0 }
0x1a90   : > { %2742 = vadd.xlane.f32.xlu1 %v2741_v45 }
0x1ae8   : > { %v2946_v46 = vpop.f32.mrf.mxu0 }
0x1ae9   : > { %v2950_v47 = vsub.f32 %v5564_v10, %v2946_v46 }
0x1aea   : > { %v5252_v48 = vpop.f32.mrf.mxu0 }
0x1aeb   : > { %5254 = vmatpush3.msra.mxu1 %v2950_v47 }
0x1aec   : > { %5256 = vmatmul.mubr.msk.f32.vlgmr.msra.gmra.mxu1 %vm368_vm2, %v2872_v32  ;;  %5263 = vmatprep.subr.mxu1 %v5450_v0 }
0x1aed   : > { %5265 = vmatprep.mubr.msk.f32.mxu1 %vm5451_vm0, %v5450_v0 }
0x1bac   : > { %v3017_v49 = vpop.f32.mrf.mxu1 }
0x1bad   : > { %v3021_v50 = vsub.f32 %v5571_v14, %v3017_v49 }
0x1bae   : > { %v5257_v51 = vpop.f32.mrf.mxu1 }
0x1baf   : > { %5259 = vmatpush3.msra.mxu0 %v3021_v50  ;;  %v5440_v50 = vld [vmem:[%s5487_s11 + $0x8] sm:$0xff]  ;;  %v2716_v51 = vpop.xlane.xlu1 %2715 }
0x1bb0   : > { %5261 = vmatmul.mubr.msk.f32.vlgmr.msra.gmra.mxu0 %vm368_vm2, %v2802_v22  ;;  %5268 = vmatprep.subr.mxu0 %v5450_v0  ;;  %5434 = vrcp.f32 %v2716_v51 }
0x1bb1   : > { %5270 = vmatprep.mubr.msk.f32.mxu0 %vm5451_vm0, %v5450_v0  ;;  %4629 = vrot.lane.b32.xlu1 %v5440_v50, %s5456_s25 }
0x1c70   : > { %v3091_v52 = vpop.f32.mrf.mxu0 }
0x1c71   : > { %v3095_v54 = vmul.f32 0.25, %v3091_v52  ;;  %v5435_v52 = vpop.eup %5434 }
0x1c72   : > { %v5262_v55 = vpop.f32.mrf.mxu0 }
0x1c73   : > { %5264 = vmatpush3.msra.mxu1 %v3095_v54 }
0x1c74   : > { %5266 = vmatmul.mubr.msk.f32.vlgmr.msra.gmra.mxu1 %vm368_vm2, %v5714_v56  ;;  %5273 = vmatprep.subr.mxu1 %v5450_v0 }
0x1c75   : > { %5275 = vmatprep.mubr.msk.f32.mxu1 %vm5451_vm0, %v5450_v0 }
0x1d34   : > { %v3162_v57 = vpop.f32.mrf.mxu1 }
0x1d35   : > { %v3166_v58 = vsub.f32 %v5545_v53, %v3162_v57 }
0x1d36   : > { %v5267_v59 = vpop.f32.mrf.mxu1 }
0x1d37   : > { %5269 = vmatpush3.msra.mxu0 %v3166_v58  ;;  %v2719_v58 = vpop.xlane.xlu1 %2718 }
0x1d38   : > { %5271 = vmatmul.mubr.msk.f32.vlgmr.msra.gmra.mxu0 %vm368_vm2, %v3162_v57  ;;  %5278 = vmatprep.subr.mxu0 %v5450_v0 }
0x1d39   : > { %5280 = vmatprep.mubr.msk.f32.mxu0 %vm5451_vm0, %v5450_v0 }
0x1d3b   : > { %v2743_v59 = vpop.xlane.xlu1 %2742 }
0x1d3c   : > { %5436 = vrcp.f32 %v2743_v59 }
0x1d3d   : > { %5438 = vrcp.f32 %v2719_v58 }
0x1df8   : > { %v3236_v60 = vpop.f32.mrf.mxu0 }
0x1df9   : > { %v3240_v61 = vsub.f32 %v5564_v10, %v3236_v60 }
0x1dfa   : > { %v5272_v62 = vpop.f32.mrf.mxu0 }
0x1dfb   : > { %5274 = vmatpush3.msra.mxu1 %v3240_v61 }
0x1dfc   : > { %5276 = vmatmul.mubr.msk.f32.vlgmr.msra.gmra.mxu1 %vm368_vm2, %v3162_v57  ;;  %5283 = vmatprep.subr.mxu1 %v5450_v0  ;;  %v2721_v57 = vmul.f32 %v5435_v52, %v5754_v42 }
0x1dfd   : > { %5285 = vmatprep.mubr.msk.f32.mxu1 %vm5451_vm0, %v5450_v0 }
0x1ebc   : > { %v3307_v63 = vpop.f32.mrf.mxu1 }
0x1ebd   : > { %v3311_v1 = vsub.f32 %v5571_v14, %v3307_v63  ;;  %v4630_v63 = vpop.permute.xlu1 %4629 }
0x1ebe   : > { %v5277_v2 = vpop.f32.mrf.mxu1 }
0x1ebf   : > { %5279 = vmatpush3.msra.mxu0 %v3311_v1  ;;  %v5437_v1 = vpop.eup %5436 }
0x1ec0   : > { %5281 = vmatmul.mubr.msk.f32.vlgmr.msra.gmra.mxu0 %vm368_vm2, %v3095_v54  ;;  %5288 = vmatprep.subr.mxu0 %v5450_v0  ;;  %v2745_v42 = vmul.f32 %v5437_v1, %v5760_v44 }
0x1ec1   : > { %5290 = vmatprep.mubr.msk.f32.mxu0 %vm5451_vm0, %v5450_v0 }
0x1f80   : > { %v3381_v6 = vpop.f32.mrf.mxu0 }
0x1f81   : > { %v3385_v7 = vmul.f32 0.25, %v3381_v6 }
0x1f82   : > { %v5282_v9 = vpop.f32.mrf.mxu0 }
0x1f83   : > { %5284 = vmatpush3.msra.mxu1 %v3385_v7 }
0x1f84   : > { %5286 = vmatmul.mubr.msk.f32.vlgmr.msra.gmra.mxu1 %vm368_vm2, %v5714_v56  ;;  %5293 = vmatprep.subr.mxu1 %v5450_v0 }
0x1f85   : > { %5295 = vmatprep.mubr.msk.f32.mxu1 %vm5451_vm0, %v5450_v0 }
0x2044   : > { %v3452_v11 = vpop.f32.mrf.mxu1 }
0x2045   : > { %v3456_v12 = vsub.f32 %v5545_v53, %v3452_v11 }
0x2046   : > { %v5287_v13 = vpop.f32.mrf.mxu1 }
0x2047   : > { %5289 = vmatpush3.msra.mxu0 %v3456_v12 }
0x2048   : > { %5291 = vmatmul.mubr.msk.f32.vlgmr.msra.gmra.mxu0 %vm368_vm2, %v3452_v11  ;;  %5298 = vmatprep.subr.mxu0 %v5450_v0 }
0x2049   : > { %5300 = vmatprep.mubr.msk.f32.mxu0 %vm5451_vm0, %v5450_v0 }
0x2108   : > { %v3526_v15 = vpop.f32.mrf.mxu0 }
0x2109   : > { %v3530_v17 = vsub.f32 %v5564_v10, %v3526_v15 }
0x210a   : > { %v5292_v18 = vpop.f32.mrf.mxu0 }
0x210b   : > { %5294 = vmatpush3.msra.mxu1 %v3530_v17 }
0x210c   : > { %5296 = vmatmul.mubr.msk.f32.vlgmr.msra.gmra.mxu1 %vm368_vm2, %v3452_v11  ;;  %5303 = vmatprep.subr.mxu1 %v5450_v0 }
0x210d   : > { %5305 = vmatprep.mubr.msk.f32.mxu1 %vm5451_vm0, %v5450_v0 }
0x21cc   : > { %v3597_v19 = vpop.f32.mrf.mxu1 }
0x21cd   : > { %v3601_v26 = vsub.f32 %v5571_v14, %v3597_v19 }
0x21ce   : > { %v5297_v27 = vpop.f32.mrf.mxu1 }
0x21cf   : > { %5299 = vmatpush3.msra.mxu0 %v3601_v26 }
0x21d0   : > { %5301 = vmatmul.mubr.msk.f32.vlgmr.msra.gmra.mxu0 %vm368_vm2, %v3385_v7  ;;  %5308 = vmatprep.subr.mxu0 %v5450_v0 }
0x21d1   : > { %5310 = vmatprep.mubr.msk.f32.mxu0 %vm5451_vm0, %v5450_v0 }
0x2290   : > { %v3671_v16 = vpop.f32.mrf.mxu0 }
0x2291   : > { %v3675_v20 = vmul.f32 0.25, %v3671_v16 }
0x2292   : > { %v5302_v21 = vpop.f32.mrf.mxu0 }
0x2293   : > { %5304 = vmatpush3.msra.mxu1 %v3675_v20 }
0x2294   : > { %5306 = vmatmul.mubr.msk.f32.vlgmr.msra.gmra.mxu1 %vm368_vm2, %v5714_v56  ;;  %5313 = vmatprep.subr.mxu1 %v5450_v0 }
0x2295   : > { %5315 = vmatprep.mubr.msk.f32.mxu1 %vm5451_vm0, %v5450_v0 }
0x2354   : > { %v3742_v22 = vpop.f32.mrf.mxu1 }
0x2355   : > { %v3746_v23 = vsub.f32 %v5545_v53, %v3742_v22 }
0x2356   : > { %v5307_v24 = vpop.f32.mrf.mxu1 }
0x2357   : > { %5309 = vmatpush3.msra.mxu0 %v3746_v23 }
0x2358   : > { %5311 = vmatmul.mubr.msk.f32.vlgmr.msra.gmra.mxu0 %vm368_vm2, %v3742_v22  ;;  %5318 = vmatprep.subr.mxu0 %v5450_v0 }
0x2359   : > { %5320 = vmatprep.mubr.msk.f32.mxu0 %vm5451_vm0, %v5450_v0 }
0x2418   : > { %v3816_v25 = vpop.f32.mrf.mxu0 }
0x2419   : > { %v3820_v28 = vsub.f32 %v5564_v10, %v3816_v25 }
0x241a   : > { %v5312_v29 = vpop.f32.mrf.mxu0 }
0x241b   : > { %5314 = vmatpush3.msra.mxu1 %v3820_v28 }
0x241c   : > { %5316 = vmatmul.mubr.msk.f32.vlgmr.msra.gmra.mxu1 %vm368_vm2, %v3742_v22  ;;  %5323 = vmatprep.subr.mxu1 %v5450_v0 }
0x241d   : > { %5325 = vmatprep.mubr.msk.f32.mxu1 %vm5451_vm0, %v5450_v0 }
0x24dc   : > { %v3887_v30 = vpop.f32.mrf.mxu1 }
0x24dd   : > { %v3891_v31 = vsub.f32 %v5571_v14, %v3887_v30 }
0x24de   : > { %v5317_v32 = vpop.f32.mrf.mxu1 }
0x24df   : > { %5319 = vmatpush3.msra.mxu0 %v3891_v31 }
0x24e0   : > { %5321 = vmatmul.mubr.msk.f32.vlgmr.msra.gmra.mxu0 %vm368_vm2, %v3675_v20  ;;  %5328 = vmatprep.subr.mxu0 %v5450_v0 }
0x24e1   : > { %5330 = vmatprep.mubr.msk.f32.mxu0 %vm5451_vm0, %v5450_v0 }
0x25a0   : > { %v3961_v33 = vpop.f32.mrf.mxu0 }
0x25a1   : > { %v3965_v34 = vmul.f32 0.25, %v3961_v33 }
0x25a2   : > { %v5322_v3 = vpop.f32.mrf.mxu0 }
0x25a3   : > { %5324 = vmatpush3.msra.mxu1 %v3965_v34 }
0x25a4   : > { %5326 = vmatmul.mubr.msk.f32.vlgmr.msra.gmra.mxu1 %vm368_vm2, %v5714_v56  ;;  %5333 = vmatprep.subr.mxu1 %v5450_v0 }
0x25a5   : > { %5335 = vmatprep.mubr.msk.f32.mxu1 %vm5451_vm0, %v5450_v0 }
0x2664   : > { %v4032_v35 = vpop.f32.mrf.mxu1 }
0x2665   : > { %v4036_v36 = vsub.f32 %v5545_v53, %v4032_v35 }
0x2666   : > { %v5327_v37 = vpop.f32.mrf.mxu1 }
0x2667   : > { %5329 = vmatpush3.msra.mxu0 %v4036_v36 }
0x2668   : > { %5331 = vmatmul.mubr.msk.f32.vlgmr.msra.gmra.mxu0 %vm368_vm2, %v4032_v35  ;;  %5338 = vmatprep.subr.mxu0 %v5450_v0 }
0x2669   : > { %5340 = vmatprep.mubr.msk.f32.mxu0 %vm5451_vm0, %v5450_v0 }
0x2728   : > { %v4106_v38 = vpop.f32.mrf.mxu0 }
0x2729   : > { %v4110_v39 = vsub.f32 %v5564_v10, %v4106_v38 }
0x272a   : > { %v5332_v8 = vpop.f32.mrf.mxu0 }
0x272b   : > { %5334 = vmatpush3.msra.mxu1 %v4110_v39 }
0x272c   : > { %5336 = vmatmul.mubr.msk.f32.vlgmr.msra.gmra.mxu1 %vm368_vm2, %v4032_v35  ;;  %5343 = vmatprep.subr.mxu1 %v5450_v0 }
0x272d   : > { %5345 = vmatprep.mubr.msk.f32.mxu1 %vm5451_vm0, %v5450_v0 }
0x27ec   : > { %v4177_v40 = vpop.f32.mrf.mxu1 }
0x27ed   : > { %v4181_v41 = vsub.f32 %v5571_v14, %v4177_v40 }
0x27ee   : > { %v5337_v5 = vpop.f32.mrf.mxu1 }
0x27ef   : > { %5339 = vmatpush3.msra.mxu0 %v4181_v41 }
0x27f0   : > { %5341 = vmatmul.mubr.msk.f32.vlgmr.msra.gmra.mxu0 %vm368_vm2, %v3965_v34  ;;  %5348 = vmatprep.subr.mxu0 %v5450_v0 }
0x27f1   : > { %5350 = vmatprep.mubr.msk.f32.mxu0 %vm5451_vm0, %v5450_v0 }
0x28b0   : > { %v4251_v43 = vpop.f32.mrf.mxu0 }
0x28b1   : > { %v4255_v45 = vmul.f32 0.25, %v4251_v43 }
0x28b2   : > { %v5342_v46 = vpop.f32.mrf.mxu0 }
0x28b3   : > { %5344 = vmatpush3.msra.mxu1 %v4255_v45 }
0x28b4   : > { %5346 = vmatmul.mubr.msk.f32.vlgmr.msra.gmra.mxu1 %vm368_vm2, %v5714_v56  ;;  %5353 = vmatprep.subr.mxu1 %v5450_v0  ;;  %v5441_v56 = vld [vmem:[%s5487_s11] sm:$0xff] }
0x28b5   : > { %5355 = vmatprep.mubr.msk.f32.mxu1 %vm5451_vm0, %v5450_v0  ;;  %4627 = vrot.lane.b32.xlu0 %v5441_v56, %s5456_s25 }
0x2974   : > { %v4322_v47 = vpop.f32.mrf.mxu1 }
0x2975   : > { %v4326_v48 = vsub.f32 %v5545_v53, %v4322_v47 }
0x2976   : > { %v5347_v49 = vpop.f32.mrf.mxu1 }
0x2977   : > { %5349 = vmatpush3.msra.mxu0 %v4326_v48 }
0x2978   : > { %5351 = vmatmul.mubr.msk.f32.vlgmr.msra.gmra.mxu0 %vm368_vm2, %v4322_v47  ;;  %5358 = vmatprep.subr.mxu0 %v5450_v0 }
0x2979   : > { %5360 = vmatprep.mubr.msk.f32.mxu0 %vm5451_vm0, %v5450_v0 }
0x2a38   : > { %v4396_v54 = vpop.f32.mrf.mxu0 }
0x2a39   : > { %v4400_v53 = vsub.f32 %v5564_v10, %v4396_v54  ;;  %v4628_v10 = vpop.permute.xlu0 %4627 }
0x2a3a   : > { %v5352_v55 = vpop.f32.mrf.mxu0 }
0x2a3b   : > { %5354 = vmatpush3.msra.mxu1 %v4400_v53 }
0x2a3c   : > { %5356 = vmatmul.mubr.msk.f32.vlgmr.msra.gmra.mxu1 %vm368_vm2, %v4322_v47 }
0x2a3d   : > { %5365 = vmatprep.mubr.msk.f32.mxu1 %vm368_vm2, %v2721_v57 }
0x2afc   : > { %v4467_v60 = vpop.f32.mrf.mxu1 }
0x2afd   : > { %v4471_v61 = vsub.f32 %v5571_v14, %v4467_v60  ;;  %v5439_v14 = vpop.eup %5438 }
0x2afe   : > { %v5357_v62 = vpop.f32.mrf.mxu1  ;;  %v2723_v9 = vmul.f32 %v5439_v14, %v5752_v4 }
0x2aff   : > { %5359 = vmatpush3.msra.mxu0 %v4471_v61 }
0x2b00   : > { %5361 = vmatmul.mubr.msk.f32.vlgmr.msra.gmra.mxu0 %vm368_vm2, %v4255_v45  ;;  %5368 = vmatprep.subr.mxu0 %v5450_v0 }
0x2b01   : > { %5369 = vmatpush3.msra.mxu0 %v4630_v63  ;;  %5372 = vmatprep.mubr.msk.f32.mxu0 %vm5451_vm0, %v5450_v0 }
0x2b02   : > { %5370 = vmatprep.subr.mxu0 %v5450_v0 }
0x2b03   : > { %5371 = vmatpush3.msra.mxu0 %v4628_v10 }
0x2b04   : > { %5373 = vmatmul.mubr.msk.f32.vlgmr.msra.gmra.mxu0 %vm134_vm1, %v2745_v42 }
0x2bc0   : > { %v4541_v2 = vpop.f32.mrf.mxu0 }
0x2bc1   : > { %v4545_v6 = vmul.f32 0.25, %v4541_v2 }
0x2bc2   : > { %v5362_v7 = vpop.f32.mrf.mxu0 }
0x2bc3   : > { %5363 = vmatprep.subr.mxu1 %v4545_v6 }
0x2bc4   : > { %5364 = vmatpush3.msra.mxu1 %v4545_v6  ;;  %v4702_v11 = vpop.f32.mrf.mxu0 }
0x2bc5   : > { %5366 = vmatmul.mubr.msk.f32.vlgmr.msra.gmra.mxu1 %vm368_vm2, %v2723_v9  ;;  %5375 = vmatprep.subr.mxu1 %v4702_v11 }
0x2bc6   : > { %v5374_v0 = vpop.f32.mrf.mxu0  ;;  %5376 = vmatpush3.msra.mxu1 %v4702_v11 }
0x2c85   : > { %v5367_v44 = vpop.f32.mrf.mxu1 }
0x2c87   : > { %v4618_v12 = vpop.f32.mrf.mxu1 }
0x2c88   : > { %5377 = vmatprep.mubr.msk.f32.mxu1 %vm368_vm2, %v4618_v12 }
0x2c89   : > { %5378 = vmatmul.mubr.msk.f32.vlgmr.msra.gmra.mxu1 %vm368_vm2, %v5367_v44 }
0x2d49   : > { %v5379_v13 = vpop.f32.mrf.mxu1 }
0x2d4b   : > { %v4778_v15 = vpop.f32.mrf.mxu1 }
0x2d4c   : > { %4789 = vrot.lane.b32.xlu1 %v4778_v15, %s5457_s26 }
0x2d50   : > { %4791 = vrot.lane.b32.xlu1 %v5379_v13, %s5457_s26 }
0x2dbe   : > { %v4790_v4 = vpop.permute.xlu1 %4789 }
0x2dbf   : > { %4796 = vst.msk [vmem:[%s5706_s21] sm:$0xff] %vm4795_vm4, %v4790_v4 }
0x2dc2   : > { %v4792_v17 = vpop.permute.xlu1 %4791 }
0x2dc3   : > { %4797 = vst.msk [vmem:[%s5706_s21 + $0x8] sm:$0xff] %vm4795_vm4, %v4792_v17 }
0x2dc4 PF: > { %s11_s6 = sadd.s32 1, %s5448_s6  }
0x2dc5   : > { %p8_p4 = scmp.ge.s32.totalorder %s11_s6, 4  }
0x2dc7   :  { %10 = sbr.rel (!%p8_p4) target bundleno = 1 (0x1), region = 55 }

</bundles_post_ra>
